<compile_context>
chip_gen: v5e
topology: v5e:2x2
jax: 0.10.0
libtpu: 0.0.40
codegen_flags: <defaults>
</compile_context>

<pallas_src>
import math

import jax
import jax.numpy as jnp
from jax.experimental import pallas as pl
from jax.experimental.pallas import tpu as pltpu

# ----------------------------- model config ---------------------------------
VOCAB = 100
HIDDEN = 32
NUM_HEADS = 4
HEAD_DIM = HIDDEN // NUM_HEADS
NUM_LAYERS = 2
INTERMEDIATE = 64
MAX_POS = 16
TYPE_VOCAB = 2
NUM_CLASSES = 5
BATCH = 2
SEQ = 8

CLS_PAD = 128            # lane-dense classifier output width (sliced to NUM_CLASSES in wrapper)
MATMUL_DTYPE = jnp.bfloat16  # MXU operand dtype (bf16 in / f32 accumulate)

# rows of the packed per-layer vector slab (L, 8, 3H)
ROW_BQKV, ROW_BO, ROW_LN1G, ROW_LN1B, ROW_B1, ROW_B2, ROW_LN2G, ROW_LN2B = range(8)
# rows of the packed global vector slab (4, 128)
GROW_EMB_G, GROW_EMB_B, GROW_POOL_B, GROW_CLS_B = range(4)


# ----------------------------- in-kernel helpers -----------------------------
def _layer_norm(x, g, b, eps=1e-12):
    mean = jnp.mean(x, axis=-1, keepdims=True)
    var = jnp.mean(jnp.square(x - mean), axis=-1, keepdims=True)
    return (x - mean) * jax.lax.rsqrt(var + eps) * g + b


def _gelu_tanh(y):
    # TODO(synk): HF BERT default is erf-GELU; tanh approximation used (EUP-friendly).
    return 0.5 * y * (1.0 + jnp.tanh(0.7978845608028654 * (y + 0.044715 * y * y * y)))


def _matmul(x, w, b):
    # bf16 MXU operands, f32 accumulation, f32 bias add.
    return jnp.dot(x.astype(MATMUL_DTYPE), w, preferred_element_type=jnp.float32) + b


# ----------------------------- fused kernel ----------------------------------
def _bert_fused_kernel(
    ids_ref, tt_ref, am_ref,
    wemb_ref, pemb_ref, temb_ref,
    wqkv_ref, wo_ref, w1_ref, w2_ref, lvec_ref,
    pool_w_ref, cls_w_ref, gvec_ref,
    out_ref,
):
    """Whole model (all batch elements) in one kernel invocation, VMEM/vreg-resident."""
    B, S, H, nh, dh, I = BATCH, SEQ, HIDDEN, NUM_HEADS, HEAD_DIM, INTERMEDIATE
    BS = B * S

    # packed global vectors
    gvec = gvec_ref[...]                                             # (4, 128) f32
    emb_g = gvec[GROW_EMB_G:GROW_EMB_G + 1, 0:H]
    emb_b = gvec[GROW_EMB_B:GROW_EMB_B + 1, 0:H]
    pool_b = gvec[GROW_POOL_B:GROW_POOL_B + 1, 0:H]
    cls_b = gvec[GROW_CLS_B:GROW_CLS_B + 1, :]                       # (1, 128)

    # ---- embeddings: gathers as one-hot (iota + compare) MXU matmuls ----
    ids = ids_ref[...]                                               # (BS, 1) int32
    word_oh = (ids == jax.lax.broadcasted_iota(jnp.int32, (BS, VOCAB), 1)).astype(jnp.float32)
    word = jnp.dot(word_oh, wemb_ref[...], preferred_element_type=jnp.float32)

    tt = tt_ref[...]                                                 # (BS, 1) int32
    tt_oh = (tt == jax.lax.broadcasted_iota(jnp.int32, (BS, TYPE_VOCAB), 1)).astype(jnp.float32)
    type_e = jnp.dot(tt_oh, temb_ref[...], preferred_element_type=jnp.float32)

    pos = pemb_ref[0:S, :]                                           # (S, H)
    pos_all = jnp.concatenate([pos] * B, axis=0)                     # (BS, H)

    x = _layer_norm(word + pos_all + type_e, emb_g, emb_b)           # (BS, H) f32

    # ---- additive attention mask, built & broadcast ONCE (hoisted out of all loops) ----
    am = am_ref[...].astype(jnp.float32)                             # (B, 1, S)
    add_mask = jnp.broadcast_to((1.0 - am) * -1e9, (B, S, S))        # (B, S, S)

    for l in range(NUM_LAYERS):                                      # tiny static unroll
        lv = lvec_ref[l]                                             # (8, 3H) packed vectors
        bqkv = lv[ROW_BQKV:ROW_BQKV + 1, :]                          # (1, 3H)
        bo = lv[ROW_BO:ROW_BO + 1, 0:H]
        ln1g = lv[ROW_LN1G:ROW_LN1G + 1, 0:H]
        ln1b = lv[ROW_LN1B:ROW_LN1B + 1, 0:H]
        b1 = lv[ROW_B1:ROW_B1 + 1, 0:I]
        b2 = lv[ROW_B2:ROW_B2 + 1, 0:H]
        ln2g = lv[ROW_LN2G:ROW_LN2G + 1, 0:H]
        ln2b = lv[ROW_LN2B:ROW_LN2B + 1, 0:H]

        # fused QKV on all B*S rows; 1/sqrt(dh) is pre-folded into the Q columns of wqkv.
        qkv = _matmul(x, wqkv_ref[l], bqkv)                          # (BS, 3H) f32
        q = qkv[:, 0:H]
        k = qkv[:, H:2 * H]
        v = qkv[:, 2 * H:3 * H]

        heads = []
        for h in range(nh):
            sl = slice(h * dh, (h + 1) * dh)
            qh = q[:, sl].reshape(B, S, dh)                          # leading-dim split only
            kh = k[:, sl].reshape(B, S, dh)
            vh = v[:, sl].reshape(B, S, dh)
            s = jnp.einsum('bqd,bkd->bqk', qh, kh,
                           preferred_element_type=jnp.float32) + add_mask
            s = s - jnp.max(s, axis=-1, keepdims=True)
            p = jnp.exp(s)
            p = p * pl.reciprocal(jnp.sum(p, axis=-1, keepdims=True), approx=True)
            ctx = jnp.einsum('bqk,bkd->bqd', p, vh,
                             preferred_element_type=jnp.float32)     # (B, S, dh)
            heads.append(ctx.reshape(BS, dh))
        ctx = jnp.concatenate(heads, axis=-1)                        # (BS, H), register-resident

        x = _layer_norm(x + _matmul(ctx, wo_ref[l], bo), ln1g, ln1b)
        ff = _gelu_tanh(_matmul(x, w1_ref[l], b1))                   # (BS, I)
        x = _layer_norm(x + _matmul(ff, w2_ref[l], b2), ln2g, ln2b)

    # ---- pooler + classifier on ALL rows: keeps the store fully lane-dense/unmasked.
    # The wrapper picks the CLS rows (token 0 per sequence) and first NUM_CLASSES lanes.
    pooled = jnp.tanh(_matmul(x, pool_w_ref[...], pool_b))           # (BS, H)
    out_ref[...] = _matmul(pooled, cls_w_ref[...], cls_b)            # (BS, 128)


def _fixed_spec(shape):
    """Whole-array block, same block for the single grid step."""
    if len(shape) == 2:
        return pl.BlockSpec(shape, lambda i: (0, 0))
    assert len(shape) == 3
    return pl.BlockSpec(shape, lambda i: (0, 0, 0))


# ----------------------------- parameter init -------------------------------
def init_params(key):
    keys = iter(jax.random.split(key, 32))
    H, I, L, C = HIDDEN, INTERMEDIATE, NUM_LAYERS, NUM_CLASSES

    def dense(fan_in, fan_out):
        return jax.random.normal(next(keys), (fan_in, fan_out), jnp.float32) * 0.02

    scale = 1.0 / math.sqrt(HEAD_DIM)

    wqkv, wo, w1, w2 = [], [], [], []
    for _ in range(L):
        wq = dense(H, H) * scale                      # attention scale folded into Q projection
        wk = dense(H, H)
        wv = dense(H, H)
        wqkv.append(jnp.concatenate([wq, wk, wv], axis=1))            # fused QKV (H, 3H)
        wo.append(dense(H, H))
        w1.append(dense(H, I))
        w2.append(dense(I, H))

    def stack_bf16(ws):
        return jnp.stack(ws, axis=0).astype(MATMUL_DTYPE)

    # packed per-layer vectors: (L, 8, 3H). Note: if bqkv were nonzero, its Q third would
    # also be pre-scaled by 1/sqrt(dh) (it is all zeros here).
    lvec = jnp.zeros((L, 8, 3 * H), jnp.float32)
    lvec = lvec.at[:, ROW_LN1G, 0:H].set(1.0)
    lvec = lvec.at[:, ROW_LN2G, 0:H].set(1.0)

    # packed global vectors: (4, 128) = emb LN gamma/beta, pooler bias, classifier bias.
    gvec = jnp.zeros((4, CLS_PAD), jnp.float32)
    gvec = gvec.at[GROW_EMB_G, 0:H].set(1.0)

    # classifier weight padded to 128 lanes (lane-dense output block).
    cls_w = jnp.zeros((H, CLS_PAD), jnp.float32).at[:, 0:C].set(dense(H, C))

    return {
        "word_emb": jax.random.normal(next(keys), (VOCAB, H), jnp.float32) * 0.02,
        "pos_emb": jax.random.normal(next(keys), (MAX_POS, H), jnp.float32) * 0.02,
        "type_emb": jax.random.normal(next(keys), (TYPE_VOCAB, H), jnp.float32) * 0.02,
        "wqkv": stack_bf16(wqkv),
        "wo": stack_bf16(wo),
        "w1": stack_bf16(w1),
        "w2": stack_bf16(w2),
        "layer_vecs": lvec,
        "glob_vecs": gvec,
        "pool_w": dense(H, H).astype(MATMUL_DTYPE),
        "cls_w": cls_w.astype(MATMUL_DTYPE),
    }


# ----------------------------- forward pass ----------------------------------
@jax.jit
def bert_type_classification_forward(params, input_ids, attention_mask, token_type_ids):
    B, S = input_ids.shape
    BS = B * S

    ids = input_ids.reshape(BS, 1).astype(jnp.int32)
    tts = token_type_ids.reshape(BS, 1).astype(jnp.int32)
    am = attention_mask.reshape(B, 1, S).astype(jnp.int32)   # additive mask built in-kernel

    args = (
        ids, tts, am,
        params["word_emb"], params["pos_emb"], params["type_emb"],
        params["wqkv"], params["wo"], params["w1"], params["w2"], params["layer_vecs"],
        params["pool_w"], params["cls_w"], params["glob_vecs"],
    )

    out = pl.pallas_call(
        _bert_fused_kernel,
        out_shape=jax.ShapeDtypeStruct((BS, CLS_PAD), jnp.float32),
        grid=(1,),                                            # whole model = one grid step
        in_specs=[_fixed_spec(a.shape) for a in args],
        out_specs=pl.BlockSpec((BS, CLS_PAD), lambda i: (0, 0)),
        compiler_params=pltpu.CompilerParams(
            dimension_semantics=("arbitrary",),               # overhead-bound; no megacore split
        ),
    )(*args)

    # CLS rows (token 0 of each sequence), first NUM_CLASSES lanes.
    return out.reshape(B, S, CLS_PAD)[:, 0, :NUM_CLASSES]


# ----------------------------- main ------------------------------------------
if __name__ == "__main__":
    key = jax.random.PRNGKey(0)
    pkey, dkey = jax.random.split(key)
    params = init_params(pkey)

    input_ids = jax.random.randint(dkey, (BATCH, SEQ), 0, VOCAB, dtype=jnp.int32)
    attention_mask = jnp.ones((BATCH, SEQ), dtype=jnp.int32)
    token_type_ids = jnp.zeros((BATCH, SEQ), dtype=jnp.int32)

    logits = bert_type_classification_forward(params, input_ids, attention_mask, token_type_ids)
    logits = jax.block_until_ready(logits)
    assert logits.shape == (BATCH, NUM_CLASSES)
    assert bool(jnp.all(jnp.isfinite(logits)))
    print("KERNEL_OK")
</pallas_src>

<mosaic_0001>
module attributes {stable_mosaic.version = 11 : i64} {
  func.func @_bert_fused_kernel(%arg0: i32, %arg1: memref<16x1xi32, #tpu.memory_space<vmem>>, %arg2: memref<16x1xi32, #tpu.memory_space<vmem>>, %arg3: memref<2x1x8xi32, #tpu.memory_space<vmem>>, %arg4: memref<100x32xf32, #tpu.memory_space<vmem>>, %arg5: memref<16x32xf32, #tpu.memory_space<vmem>>, %arg6: memref<2x32xf32, #tpu.memory_space<vmem>>, %arg7: memref<2x32x96xbf16, #tpu.memory_space<vmem>>, %arg8: memref<2x32x32xbf16, #tpu.memory_space<vmem>>, %arg9: memref<2x32x64xbf16, #tpu.memory_space<vmem>>, %arg10: memref<2x64x32xbf16, #tpu.memory_space<vmem>>, %arg11: memref<2x8x96xf32, #tpu.memory_space<vmem>>, %arg12: memref<32x32xbf16, #tpu.memory_space<vmem>>, %arg13: memref<32x128xbf16, #tpu.memory_space<vmem>>, %arg14: memref<4x128xf32, #tpu.memory_space<vmem>>, %arg15: memref<16x128xf32, #tpu.memory_space<vmem>>) attributes {dimension_semantics = [#tpu.dimension_semantics<arbitrary>], iteration_bounds = array<i64: 1>, scalar_prefetch = 0 : i64, scratch_operands = 0 : i64, tpu.core_type = #tpu.core_type<tc>, window_params = [{pipeline_mode = #tpu.pipeline_mode<synchronous>, transform_indices = @transform_0, window_bounds = array<i64: 16, 1>}, {pipeline_mode = #tpu.pipeline_mode<synchronous>, transform_indices = @transform_1, window_bounds = array<i64: 16, 1>}, {pipeline_mode = #tpu.pipeline_mode<synchronous>, transform_indices = @transform_2, window_bounds = array<i64: 2, 1, 8>}, {pipeline_mode = #tpu.pipeline_mode<synchronous>, transform_indices = @transform_3, window_bounds = array<i64: 100, 32>}, {pipeline_mode = #tpu.pipeline_mode<synchronous>, transform_indices = @transform_4, window_bounds = array<i64: 16, 32>}, {pipeline_mode = #tpu.pipeline_mode<synchronous>, transform_indices = @transform_5, window_bounds = array<i64: 2, 32>}, {pipeline_mode = #tpu.pipeline_mode<synchronous>, transform_indices = @transform_6, window_bounds = array<i64: 2, 32, 96>}, {pipeline_mode = #tpu.pipeline_mode<synchronous>, transform_indices = @transform_7, window_bounds = array<i64: 2, 32, 32>}, {pipeline_mode = #tpu.pipeline_mode<synchronous>, transform_indices = @transform_8, window_bounds = array<i64: 2, 32, 64>}, {pipeline_mode = #tpu.pipeline_mode<synchronous>, transform_indices = @transform_9, window_bounds = array<i64: 2, 64, 32>}, {pipeline_mode = #tpu.pipeline_mode<synchronous>, transform_indices = @transform_10, window_bounds = array<i64: 2, 8, 96>}, {pipeline_mode = #tpu.pipeline_mode<synchronous>, transform_indices = @transform_11, window_bounds = array<i64: 32, 32>}, {pipeline_mode = #tpu.pipeline_mode<synchronous>, transform_indices = @transform_12, window_bounds = array<i64: 32, 128>}, {pipeline_mode = #tpu.pipeline_mode<synchronous>, transform_indices = @transform_13, window_bounds = array<i64: 4, 128>}, {pipeline_mode = #tpu.pipeline_mode<synchronous>, transform_indices = @transform_14, window_bounds = array<i64: 16, 128>}]} {
    %c0 = arith.constant 0 : index
    %c0_0 = arith.constant 0 : index
    %0 = vector.load %arg14[%c0, %c0_0] : memref<4x128xf32, #tpu.memory_space<vmem>>, vector<4x128xf32>
    %1 = vector.extract_strided_slice %0 {offsets = [0, 0], sizes = [1, 32], strides = [1, 1]} : vector<4x128xf32> to vector<1x32xf32>
    %2 = vector.extract_strided_slice %0 {offsets = [1, 0], sizes = [1, 32], strides = [1, 1]} : vector<4x128xf32> to vector<1x32xf32>
    %3 = vector.extract_strided_slice %0 {offsets = [2, 0], sizes = [1, 32], strides = [1, 1]} : vector<4x128xf32> to vector<1x32xf32>
    %4 = vector.extract_strided_slice %0 {offsets = [3, 0], sizes = [1, 128], strides = [1, 1]} : vector<4x128xf32> to vector<1x128xf32>
    %c0_1 = arith.constant 0 : index
    %c0_2 = arith.constant 0 : index
    %5 = vector.load %arg1[%c0_1, %c0_2] : memref<16x1xi32, #tpu.memory_space<vmem>>, vector<16x1xi32>
    %6 = tpu.iota {dimensions = array<i32: 1>} : vector<16x100xi32>
    %7 = vector.broadcast %5 : vector<16x1xi32> to vector<16x100xi32>
    %8 = arith.cmpi eq, %7, %6 : vector<16x100xi32>
    %9 = arith.extui %8 : vector<16x100xi1> to vector<16x100xi32>
    %10 = arith.sitofp %9 : vector<16x100xi32> to vector<16x100xf32>
    %c0_3 = arith.constant 0 : index
    %c0_4 = arith.constant 0 : index
    %11 = vector.load %arg4[%c0_3, %c0_4] : memref<100x32xf32, #tpu.memory_space<vmem>>, vector<100x32xf32>
    %cst = arith.constant dense<0.000000e+00> : vector<16x32xf32>
    %12 = tpu.matmul %10, %11, %cst {dimension_numbers = #tpu.dot_dimension_numbers<[1], [0], [0], [1], [0, 0, 1, 1], [], []>} : vector<16x100xf32>, vector<100x32xf32>, vector<16x32xf32> -> vector<16x32xf32>
    %c0_5 = arith.constant 0 : index
    %c0_6 = arith.constant 0 : index
    %13 = vector.load %arg2[%c0_5, %c0_6] : memref<16x1xi32, #tpu.memory_space<vmem>>, vector<16x1xi32>
    %14 = tpu.iota {dimensions = array<i32: 1>} : vector<16x2xi32>
    %15 = vector.broadcast %13 : vector<16x1xi32> to vector<16x2xi32>
    %16 = arith.cmpi eq, %15, %14 : vector<16x2xi32>
    %17 = arith.extui %16 : vector<16x2xi1> to vector<16x2xi32>
    %18 = arith.sitofp %17 : vector<16x2xi32> to vector<16x2xf32>
    %c0_7 = arith.constant 0 : index
    %c0_8 = arith.constant 0 : index
    %19 = vector.load %arg6[%c0_7, %c0_8] : memref<2x32xf32, #tpu.memory_space<vmem>>, vector<2x32xf32>
    %cst_9 = arith.constant dense<0.000000e+00> : vector<16x32xf32>
    %20 = tpu.matmul %18, %19, %cst_9 {dimension_numbers = #tpu.dot_dimension_numbers<[1], [0], [0], [1], [0, 0, 1, 1], [], []>} : vector<16x2xf32>, vector<2x32xf32>, vector<16x32xf32> -> vector<16x32xf32>
    %c0_10 = arith.constant 0 : index
    %c0_11 = arith.constant 0 : index
    %21 = vector.load %arg5[%c0_10, %c0_11] : memref<16x32xf32, #tpu.memory_space<vmem>>, vector<8x32xf32>
    %22 = tpu.concatenate %21, %21 in 0 : vector<8x32xf32>, vector<8x32xf32> -> vector<16x32xf32>
    %23 = arith.addf %12, %22 : vector<16x32xf32>
    %24 = arith.addf %23, %20 : vector<16x32xf32>
    %cst_12 = arith.constant dense<0.000000e+00> : vector<16xf32>
    %25 = vector.multi_reduction <add>, %24, %cst_12 [1] : vector<16x32xf32> to vector<16xf32>
    %26 = vector.shape_cast %25 : vector<16xf32> to vector<16x1xf32>
    %cst_13 = arith.constant 3.200000e+01 : f32
    %27 = vector.broadcast %cst_13 : f32 to vector<16x1xf32>
    %28 = arith.divf %26, %27 : vector<16x1xf32>
    %29 = vector.broadcast %28 : vector<16x1xf32> to vector<16x32xf32>
    %30 = arith.subf %24, %29 : vector<16x32xf32>
    %31 = arith.mulf %30, %30 : vector<16x32xf32>
    %cst_14 = arith.constant dense<0.000000e+00> : vector<16xf32>
    %32 = vector.multi_reduction <add>, %31, %cst_14 [1] : vector<16x32xf32> to vector<16xf32>
    %33 = vector.shape_cast %32 : vector<16xf32> to vector<16x1xf32>
    %cst_15 = arith.constant 3.200000e+01 : f32
    %34 = vector.broadcast %cst_15 : f32 to vector<16x1xf32>
    %35 = arith.divf %33, %34 : vector<16x1xf32>
    %36 = vector.broadcast %28 : vector<16x1xf32> to vector<16x32xf32>
    %37 = arith.subf %24, %36 : vector<16x32xf32>
    %cst_16 = arith.constant 9.99999996E-13 : f32
    %38 = vector.broadcast %cst_16 : f32 to vector<16x1xf32>
    %39 = arith.addf %35, %38 : vector<16x1xf32>
    %40 = math.rsqrt %39 : vector<16x1xf32>
    %41 = vector.broadcast %40 : vector<16x1xf32> to vector<16x32xf32>
    %42 = arith.mulf %37, %41 : vector<16x32xf32>
    %43 = vector.broadcast %1 : vector<1x32xf32> to vector<16x32xf32>
    %44 = arith.mulf %42, %43 : vector<16x32xf32>
    %45 = vector.broadcast %2 : vector<1x32xf32> to vector<16x32xf32>
    %46 = arith.addf %44, %45 : vector<16x32xf32>
    %c0_17 = arith.constant 0 : index
    %c0_18 = arith.constant 0 : index
    %c0_19 = arith.constant 0 : index
    %47 = vector.load %arg3[%c0_17, %c0_18, %c0_19] : memref<2x1x8xi32, #tpu.memory_space<vmem>>, vector<2x1x8xi32>
    %48 = arith.sitofp %47 : vector<2x1x8xi32> to vector<2x1x8xf32>
    %cst_20 = arith.constant 1.000000e+00 : f32
    %49 = vector.broadcast %cst_20 : f32 to vector<2x1x8xf32>
    %50 = arith.subf %49, %48 : vector<2x1x8xf32>
    %cst_21 = arith.constant -1.000000e+09 : f32
    %51 = vector.broadcast %cst_21 : f32 to vector<2x1x8xf32>
    %52 = arith.mulf %50, %51 : vector<2x1x8xf32>
    %53 = vector.shape_cast %52 : vector<2x1x8xf32> to vector<2x1x8xf32>
    %54 = vector.broadcast %53 : vector<2x1x8xf32> to vector<2x8x8xf32>
    %c0_22 = arith.constant 0 : index
    %c0_23 = arith.constant 0 : index
    %c0_24 = arith.constant 0 : index
    %55 = vector.load %arg11[%c0_22, %c0_23, %c0_24] : memref<2x8x96xf32, #tpu.memory_space<vmem>>, vector<1x8x96xf32>
    %56 = vector.shape_cast %55 : vector<1x8x96xf32> to vector<8x96xf32>
    %57 = vector.extract_strided_slice %56 {offsets = [0, 0], sizes = [1, 96], strides = [1, 1]} : vector<8x96xf32> to vector<1x96xf32>
    %58 = vector.extract_strided_slice %56 {offsets = [1, 0], sizes = [1, 32], strides = [1, 1]} : vector<8x96xf32> to vector<1x32xf32>
    %59 = vector.extract_strided_slice %56 {offsets = [2, 0], sizes = [1, 32], strides = [1, 1]} : vector<8x96xf32> to vector<1x32xf32>
    %60 = vector.extract_strided_slice %56 {offsets = [3, 0], sizes = [1, 32], strides = [1, 1]} : vector<8x96xf32> to vector<1x32xf32>
    %61 = vector.extract_strided_slice %56 {offsets = [4, 0], sizes = [1, 64], strides = [1, 1]} : vector<8x96xf32> to vector<1x64xf32>
    %62 = vector.extract_strided_slice %56 {offsets = [5, 0], sizes = [1, 32], strides = [1, 1]} : vector<8x96xf32> to vector<1x32xf32>
    %63 = vector.extract_strided_slice %56 {offsets = [6, 0], sizes = [1, 32], strides = [1, 1]} : vector<8x96xf32> to vector<1x32xf32>
    %64 = vector.extract_strided_slice %56 {offsets = [7, 0], sizes = [1, 32], strides = [1, 1]} : vector<8x96xf32> to vector<1x32xf32>
    %c0_25 = arith.constant 0 : index
    %c0_26 = arith.constant 0 : index
    %c0_27 = arith.constant 0 : index
    %65 = vector.load %arg7[%c0_25, %c0_26, %c0_27] : memref<2x32x96xbf16, #tpu.memory_space<vmem>>, vector<1x32x96xbf16>
    %66 = vector.shape_cast %65 : vector<1x32x96xbf16> to vector<32x96xbf16>
    %67 = arith.truncf %46 : vector<16x32xf32> to vector<16x32xbf16>
    %cst_28 = arith.constant dense<0.000000e+00> : vector<16x96xf32>
    %68 = tpu.matmul %67, %66, %cst_28 {dimension_numbers = #tpu.dot_dimension_numbers<[1], [0], [0], [1], [0, 0, 1, 1], [], []>} : vector<16x32xbf16>, vector<32x96xbf16>, vector<16x96xf32> -> vector<16x96xf32>
    %69 = vector.broadcast %57 : vector<1x96xf32> to vector<16x96xf32>
    %70 = arith.addf %68, %69 : vector<16x96xf32>
    %71 = vector.extract_strided_slice %70 {offsets = [0, 0], sizes = [16, 32], strides = [1, 1]} : vector<16x96xf32> to vector<16x32xf32>
    %72 = vector.extract_strided_slice %70 {offsets = [0, 32], sizes = [16, 32], strides = [1, 1]} : vector<16x96xf32> to vector<16x32xf32>
    %73 = vector.extract_strided_slice %70 {offsets = [0, 64], sizes = [16, 32], strides = [1, 1]} : vector<16x96xf32> to vector<16x32xf32>
    %74 = vector.extract_strided_slice %71 {offsets = [0, 0], sizes = [16, 8], strides = [1, 1]} : vector<16x32xf32> to vector<16x8xf32>
    %75 = vector.shape_cast %74 : vector<16x8xf32> to vector<2x8x8xf32>
    %76 = vector.extract_strided_slice %72 {offsets = [0, 0], sizes = [16, 8], strides = [1, 1]} : vector<16x32xf32> to vector<16x8xf32>
    %77 = vector.shape_cast %76 : vector<16x8xf32> to vector<2x8x8xf32>
    %78 = vector.extract_strided_slice %73 {offsets = [0, 0], sizes = [16, 8], strides = [1, 1]} : vector<16x32xf32> to vector<16x8xf32>
    %79 = vector.shape_cast %78 : vector<16x8xf32> to vector<2x8x8xf32>
    "tpu.trace_start"() <{level = 10 : i32, message = "bqd,bkd->bqk"}> : () -> ()
    %cst_29 = arith.constant dense<0.000000e+00> : vector<2x8x8xf32>
    %80 = tpu.matmul %75, %77, %cst_29 {dimension_numbers = #tpu.dot_dimension_numbers<[2], [2], [1], [1], [0, 0, 0, 1, 1, 1], [0], [0]>} : vector<2x8x8xf32>, vector<2x8x8xf32>, vector<2x8x8xf32> -> vector<2x8x8xf32>
    "tpu.trace_stop"() : () -> ()
    %81 = arith.addf %80, %54 : vector<2x8x8xf32>
    %cst_30 = arith.constant dense<0xFF800000> : vector<2x8xf32>
    %82 = vector.multi_reduction <maximumf>, %81, %cst_30 [2] : vector<2x8x8xf32> to vector<2x8xf32>
    %83 = vector.shape_cast %82 : vector<2x8xf32> to vector<2x8x1xf32>
    %84 = vector.broadcast %83 : vector<2x8x1xf32> to vector<2x8x8xf32>
    %85 = arith.subf %81, %84 : vector<2x8x8xf32>
    %86 = math.exp %85 : vector<2x8x8xf32>
    %cst_31 = arith.constant dense<0.000000e+00> : vector<2x8xf32>
    %87 = vector.multi_reduction <add>, %86, %cst_31 [2] : vector<2x8x8xf32> to vector<2x8xf32>
    %88 = vector.shape_cast %87 : vector<2x8xf32> to vector<2x8x1xf32>
    %89 = tpu.reciprocal %88 {approx = true} : vector<2x8x1xf32> -> vector<2x8x1xf32>
    %90 = vector.broadcast %89 : vector<2x8x1xf32> to vector<2x8x8xf32>
    %91 = arith.mulf %86, %90 : vector<2x8x8xf32>
    "tpu.trace_start"() <{level = 10 : i32, message = "bqk,bkd->bqd"}> : () -> ()
    %cst_32 = arith.constant dense<0.000000e+00> : vector<2x8x8xf32>
    %92 = tpu.matmul %91, %79, %cst_32 {dimension_numbers = #tpu.dot_dimension_numbers<[2], [1], [1], [2], [0, 0, 0, 1, 1, 2], [0], [0]>} : vector<2x8x8xf32>, vector<2x8x8xf32>, vector<2x8x8xf32> -> vector<2x8x8xf32>
    "tpu.trace_stop"() : () -> ()
    %93 = vector.shape_cast %92 : vector<2x8x8xf32> to vector<16x8xf32>
    %94 = vector.extract_strided_slice %71 {offsets = [0, 8], sizes = [16, 8], strides = [1, 1]} : vector<16x32xf32> to vector<16x8xf32>
    %95 = vector.shape_cast %94 : vector<16x8xf32> to vector<2x8x8xf32>
    %96 = vector.extract_strided_slice %72 {offsets = [0, 8], sizes = [16, 8], strides = [1, 1]} : vector<16x32xf32> to vector<16x8xf32>
    %97 = vector.shape_cast %96 : vector<16x8xf32> to vector<2x8x8xf32>
    %98 = vector.extract_strided_slice %73 {offsets = [0, 8], sizes = [16, 8], strides = [1, 1]} : vector<16x32xf32> to vector<16x8xf32>
    %99 = vector.shape_cast %98 : vector<16x8xf32> to vector<2x8x8xf32>
    "tpu.trace_start"() <{level = 10 : i32, message = "bqd,bkd->bqk"}> : () -> ()
    %cst_33 = arith.constant dense<0.000000e+00> : vector<2x8x8xf32>
    %100 = tpu.matmul %95, %97, %cst_33 {dimension_numbers = #tpu.dot_dimension_numbers<[2], [2], [1], [1], [0, 0, 0, 1, 1, 1], [0], [0]>} : vector<2x8x8xf32>, vector<2x8x8xf32>, vector<2x8x8xf32> -> vector<2x8x8xf32>
    "tpu.trace_stop"() : () -> ()
    %101 = arith.addf %100, %54 : vector<2x8x8xf32>
    %cst_34 = arith.constant dense<0xFF800000> : vector<2x8xf32>
    %102 = vector.multi_reduction <maximumf>, %101, %cst_34 [2] : vector<2x8x8xf32> to vector<2x8xf32>
    %103 = vector.shape_cast %102 : vector<2x8xf32> to vector<2x8x1xf32>
    %104 = vector.broadcast %103 : vector<2x8x1xf32> to vector<2x8x8xf32>
    %105 = arith.subf %101, %104 : vector<2x8x8xf32>
    %106 = math.exp %105 : vector<2x8x8xf32>
    %cst_35 = arith.constant dense<0.000000e+00> : vector<2x8xf32>
    %107 = vector.multi_reduction <add>, %106, %cst_35 [2] : vector<2x8x8xf32> to vector<2x8xf32>
    %108 = vector.shape_cast %107 : vector<2x8xf32> to vector<2x8x1xf32>
    %109 = tpu.reciprocal %108 {approx = true} : vector<2x8x1xf32> -> vector<2x8x1xf32>
    %110 = vector.broadcast %109 : vector<2x8x1xf32> to vector<2x8x8xf32>
    %111 = arith.mulf %106, %110 : vector<2x8x8xf32>
    "tpu.trace_start"() <{level = 10 : i32, message = "bqk,bkd->bqd"}> : () -> ()
    %cst_36 = arith.constant dense<0.000000e+00> : vector<2x8x8xf32>
    %112 = tpu.matmul %111, %99, %cst_36 {dimension_numbers = #tpu.dot_dimension_numbers<[2], [1], [1], [2], [0, 0, 0, 1, 1, 2], [0], [0]>} : vector<2x8x8xf32>, vector<2x8x8xf32>, vector<2x8x8xf32> -> vector<2x8x8xf32>
    "tpu.trace_stop"() : () -> ()
    %113 = vector.shape_cast %112 : vector<2x8x8xf32> to vector<16x8xf32>
    %114 = vector.extract_strided_slice %71 {offsets = [0, 16], sizes = [16, 8], strides = [1, 1]} : vector<16x32xf32> to vector<16x8xf32>
    %115 = vector.shape_cast %114 : vector<16x8xf32> to vector<2x8x8xf32>
    %116 = vector.extract_strided_slice %72 {offsets = [0, 16], sizes = [16, 8], strides = [1, 1]} : vector<16x32xf32> to vector<16x8xf32>
    %117 = vector.shape_cast %116 : vector<16x8xf32> to vector<2x8x8xf32>
    %118 = vector.extract_strided_slice %73 {offsets = [0, 16], sizes = [16, 8], strides = [1, 1]} : vector<16x32xf32> to vector<16x8xf32>
    %119 = vector.shape_cast %118 : vector<16x8xf32> to vector<2x8x8xf32>
    "tpu.trace_start"() <{level = 10 : i32, message = "bqd,bkd->bqk"}> : () -> ()
    %cst_37 = arith.constant dense<0.000000e+00> : vector<2x8x8xf32>
    %120 = tpu.matmul %115, %117, %cst_37 {dimension_numbers = #tpu.dot_dimension_numbers<[2], [2], [1], [1], [0, 0, 0, 1, 1, 1], [0], [0]>} : vector<2x8x8xf32>, vector<2x8x8xf32>, vector<2x8x8xf32> -> vector<2x8x8xf32>
    "tpu.trace_stop"() : () -> ()
    %121 = arith.addf %120, %54 : vector<2x8x8xf32>
    %cst_38 = arith.constant dense<0xFF800000> : vector<2x8xf32>
    %122 = vector.multi_reduction <maximumf>, %121, %cst_38 [2] : vector<2x8x8xf32> to vector<2x8xf32>
    %123 = vector.shape_cast %122 : vector<2x8xf32> to vector<2x8x1xf32>
    %124 = vector.broadcast %123 : vector<2x8x1xf32> to vector<2x8x8xf32>
    %125 = arith.subf %121, %124 : vector<2x8x8xf32>
    %126 = math.exp %125 : vector<2x8x8xf32>
    %cst_39 = arith.constant dense<0.000000e+00> : vector<2x8xf32>
    %127 = vector.multi_reduction <add>, %126, %cst_39 [2] : vector<2x8x8xf32> to vector<2x8xf32>
    %128 = vector.shape_cast %127 : vector<2x8xf32> to vector<2x8x1xf32>
    %129 = tpu.reciprocal %128 {approx = true} : vector<2x8x1xf32> -> vector<2x8x1xf32>
    %130 = vector.broadcast %129 : vector<2x8x1xf32> to vector<2x8x8xf32>
    %131 = arith.mulf %126, %130 : vector<2x8x8xf32>
    "tpu.trace_start"() <{level = 10 : i32, message = "bqk,bkd->bqd"}> : () -> ()
    %cst_40 = arith.constant dense<0.000000e+00> : vector<2x8x8xf32>
    %132 = tpu.matmul %131, %119, %cst_40 {dimension_numbers = #tpu.dot_dimension_numbers<[2], [1], [1], [2], [0, 0, 0, 1, 1, 2], [0], [0]>} : vector<2x8x8xf32>, vector<2x8x8xf32>, vector<2x8x8xf32> -> vector<2x8x8xf32>
    "tpu.trace_stop"() : () -> ()
    %133 = vector.shape_cast %132 : vector<2x8x8xf32> to vector<16x8xf32>
    %134 = vector.extract_strided_slice %71 {offsets = [0, 24], sizes = [16, 8], strides = [1, 1]} : vector<16x32xf32> to vector<16x8xf32>
    %135 = vector.shape_cast %134 : vector<16x8xf32> to vector<2x8x8xf32>
    %136 = vector.extract_strided_slice %72 {offsets = [0, 24], sizes = [16, 8], strides = [1, 1]} : vector<16x32xf32> to vector<16x8xf32>
    %137 = vector.shape_cast %136 : vector<16x8xf32> to vector<2x8x8xf32>
    %138 = vector.extract_strided_slice %73 {offsets = [0, 24], sizes = [16, 8], strides = [1, 1]} : vector<16x32xf32> to vector<16x8xf32>
    %139 = vector.shape_cast %138 : vector<16x8xf32> to vector<2x8x8xf32>
    "tpu.trace_start"() <{level = 10 : i32, message = "bqd,bkd->bqk"}> : () -> ()
    %cst_41 = arith.constant dense<0.000000e+00> : vector<2x8x8xf32>
    %140 = tpu.matmul %135, %137, %cst_41 {dimension_numbers = #tpu.dot_dimension_numbers<[2], [2], [1], [1], [0, 0, 0, 1, 1, 1], [0], [0]>} : vector<2x8x8xf32>, vector<2x8x8xf32>, vector<2x8x8xf32> -> vector<2x8x8xf32>
    "tpu.trace_stop"() : () -> ()
    %141 = arith.addf %140, %54 : vector<2x8x8xf32>
    %cst_42 = arith.constant dense<0xFF800000> : vector<2x8xf32>
    %142 = vector.multi_reduction <maximumf>, %141, %cst_42 [2] : vector<2x8x8xf32> to vector<2x8xf32>
    %143 = vector.shape_cast %142 : vector<2x8xf32> to vector<2x8x1xf32>
    %144 = vector.broadcast %143 : vector<2x8x1xf32> to vector<2x8x8xf32>
    %145 = arith.subf %141, %144 : vector<2x8x8xf32>
    %146 = math.exp %145 : vector<2x8x8xf32>
    %cst_43 = arith.constant dense<0.000000e+00> : vector<2x8xf32>
    %147 = vector.multi_reduction <add>, %146, %cst_43 [2] : vector<2x8x8xf32> to vector<2x8xf32>
    %148 = vector.shape_cast %147 : vector<2x8xf32> to vector<2x8x1xf32>
    %149 = tpu.reciprocal %148 {approx = true} : vector<2x8x1xf32> -> vector<2x8x1xf32>
    %150 = vector.broadcast %149 : vector<2x8x1xf32> to vector<2x8x8xf32>
    %151 = arith.mulf %146, %150 : vector<2x8x8xf32>
    "tpu.trace_start"() <{level = 10 : i32, message = "bqk,bkd->bqd"}> : () -> ()
    %cst_44 = arith.constant dense<0.000000e+00> : vector<2x8x8xf32>
    %152 = tpu.matmul %151, %139, %cst_44 {dimension_numbers = #tpu.dot_dimension_numbers<[2], [1], [1], [2], [0, 0, 0, 1, 1, 2], [0], [0]>} : vector<2x8x8xf32>, vector<2x8x8xf32>, vector<2x8x8xf32> -> vector<2x8x8xf32>
    "tpu.trace_stop"() : () -> ()
    %153 = vector.shape_cast %152 : vector<2x8x8xf32> to vector<16x8xf32>
    %154 = tpu.concatenate %93, %113, %133, %153 in 1 : vector<16x8xf32>, vector<16x8xf32>, vector<16x8xf32>, vector<16x8xf32> -> vector<16x32xf32>
    %c0_45 = arith.constant 0 : index
    %c0_46 = arith.constant 0 : index
    %c0_47 = arith.constant 0 : index
    %155 = vector.load %arg8[%c0_45, %c0_46, %c0_47] : memref<2x32x32xbf16, #tpu.memory_space<vmem>>, vector<1x32x32xbf16>
    %156 = vector.shape_cast %155 : vector<1x32x32xbf16> to vector<32x32xbf16>
    %157 = arith.truncf %154 : vector<16x32xf32> to vector<16x32xbf16>
    %cst_48 = arith.constant dense<0.000000e+00> : vector<16x32xf32>
    %158 = tpu.matmul %157, %156, %cst_48 {dimension_numbers = #tpu.dot_dimension_numbers<[1], [0], [0], [1], [0, 0, 1, 1], [], []>} : vector<16x32xbf16>, vector<32x32xbf16>, vector<16x32xf32> -> vector<16x32xf32>
    %159 = vector.broadcast %58 : vector<1x32xf32> to vector<16x32xf32>
    %160 = arith.addf %158, %159 : vector<16x32xf32>
    %161 = arith.addf %46, %160 : vector<16x32xf32>
    %cst_49 = arith.constant dense<0.000000e+00> : vector<16xf32>
    %162 = vector.multi_reduction <add>, %161, %cst_49 [1] : vector<16x32xf32> to vector<16xf32>
    %163 = vector.shape_cast %162 : vector<16xf32> to vector<16x1xf32>
    %cst_50 = arith.constant 3.200000e+01 : f32
    %164 = vector.broadcast %cst_50 : f32 to vector<16x1xf32>
    %165 = arith.divf %163, %164 : vector<16x1xf32>
    %166 = vector.broadcast %165 : vector<16x1xf32> to vector<16x32xf32>
    %167 = arith.subf %161, %166 : vector<16x32xf32>
    %168 = arith.mulf %167, %167 : vector<16x32xf32>
    %cst_51 = arith.constant dense<0.000000e+00> : vector<16xf32>
    %169 = vector.multi_reduction <add>, %168, %cst_51 [1] : vector<16x32xf32> to vector<16xf32>
    %170 = vector.shape_cast %169 : vector<16xf32> to vector<16x1xf32>
    %cst_52 = arith.constant 3.200000e+01 : f32
    %171 = vector.broadcast %cst_52 : f32 to vector<16x1xf32>
    %172 = arith.divf %170, %171 : vector<16x1xf32>
    %173 = vector.broadcast %165 : vector<16x1xf32> to vector<16x32xf32>
    %174 = arith.subf %161, %173 : vector<16x32xf32>
    %cst_53 = arith.constant 9.99999996E-13 : f32
    %175 = vector.broadcast %cst_53 : f32 to vector<16x1xf32>
    %176 = arith.addf %172, %175 : vector<16x1xf32>
    %177 = math.rsqrt %176 : vector<16x1xf32>
    %178 = vector.broadcast %177 : vector<16x1xf32> to vector<16x32xf32>
    %179 = arith.mulf %174, %178 : vector<16x32xf32>
    %180 = vector.broadcast %59 : vector<1x32xf32> to vector<16x32xf32>
    %181 = arith.mulf %179, %180 : vector<16x32xf32>
    %182 = vector.broadcast %60 : vector<1x32xf32> to vector<16x32xf32>
    %183 = arith.addf %181, %182 : vector<16x32xf32>
    %c0_54 = arith.constant 0 : index
    %c0_55 = arith.constant 0 : index
    %c0_56 = arith.constant 0 : index
    %184 = vector.load %arg9[%c0_54, %c0_55, %c0_56] : memref<2x32x64xbf16, #tpu.memory_space<vmem>>, vector<1x32x64xbf16>
    %185 = vector.shape_cast %184 : vector<1x32x64xbf16> to vector<32x64xbf16>
    %186 = arith.truncf %183 : vector<16x32xf32> to vector<16x32xbf16>
    %cst_57 = arith.constant dense<0.000000e+00> : vector<16x64xf32>
    %187 = tpu.matmul %186, %185, %cst_57 {dimension_numbers = #tpu.dot_dimension_numbers<[1], [0], [0], [1], [0, 0, 1, 1], [], []>} : vector<16x32xbf16>, vector<32x64xbf16>, vector<16x64xf32> -> vector<16x64xf32>
    %188 = vector.broadcast %61 : vector<1x64xf32> to vector<16x64xf32>
    %189 = arith.addf %187, %188 : vector<16x64xf32>
    %cst_58 = arith.constant 5.000000e-01 : f32
    %190 = vector.broadcast %cst_58 : f32 to vector<16x64xf32>
    %191 = arith.mulf %190, %189 : vector<16x64xf32>
    %cst_59 = arith.constant 4.471500e-02 : f32
    %192 = vector.broadcast %cst_59 : f32 to vector<16x64xf32>
    %193 = arith.mulf %192, %189 : vector<16x64xf32>
    %194 = arith.mulf %193, %189 : vector<16x64xf32>
    %195 = arith.mulf %194, %189 : vector<16x64xf32>
    %196 = arith.addf %189, %195 : vector<16x64xf32>
    %cst_60 = arith.constant 0.797884583 : f32
    %197 = vector.broadcast %cst_60 : f32 to vector<16x64xf32>
    %198 = arith.mulf %197, %196 : vector<16x64xf32>
    %199 = math.tanh %198 : vector<16x64xf32>
    %cst_61 = arith.constant 1.000000e+00 : f32
    %200 = vector.broadcast %cst_61 : f32 to vector<16x64xf32>
    %201 = arith.addf %200, %199 : vector<16x64xf32>
    %202 = arith.mulf %191, %201 : vector<16x64xf32>
    %c0_62 = arith.constant 0 : index
    %c0_63 = arith.constant 0 : index
    %c0_64 = arith.constant 0 : index
    %203 = vector.load %arg10[%c0_62, %c0_63, %c0_64] : memref<2x64x32xbf16, #tpu.memory_space<vmem>>, vector<1x64x32xbf16>
    %204 = vector.shape_cast %203 : vector<1x64x32xbf16> to vector<64x32xbf16>
    %205 = arith.truncf %202 : vector<16x64xf32> to vector<16x64xbf16>
    %cst_65 = arith.constant dense<0.000000e+00> : vector<16x32xf32>
    %206 = tpu.matmul %205, %204, %cst_65 {dimension_numbers = #tpu.dot_dimension_numbers<[1], [0], [0], [1], [0, 0, 1, 1], [], []>} : vector<16x64xbf16>, vector<64x32xbf16>, vector<16x32xf32> -> vector<16x32xf32>
    %207 = vector.broadcast %62 : vector<1x32xf32> to vector<16x32xf32>
    %208 = arith.addf %206, %207 : vector<16x32xf32>
    %209 = arith.addf %183, %208 : vector<16x32xf32>
    %cst_66 = arith.constant dense<0.000000e+00> : vector<16xf32>
    %210 = vector.multi_reduction <add>, %209, %cst_66 [1] : vector<16x32xf32> to vector<16xf32>
    %211 = vector.shape_cast %210 : vector<16xf32> to vector<16x1xf32>
    %cst_67 = arith.constant 3.200000e+01 : f32
    %212 = vector.broadcast %cst_67 : f32 to vector<16x1xf32>
    %213 = arith.divf %211, %212 : vector<16x1xf32>
    %214 = vector.broadcast %213 : vector<16x1xf32> to vector<16x32xf32>
    %215 = arith.subf %209, %214 : vector<16x32xf32>
    %216 = arith.mulf %215, %215 : vector<16x32xf32>
    %cst_68 = arith.constant dense<0.000000e+00> : vector<16xf32>
    %217 = vector.multi_reduction <add>, %216, %cst_68 [1] : vector<16x32xf32> to vector<16xf32>
    %218 = vector.shape_cast %217 : vector<16xf32> to vector<16x1xf32>
    %cst_69 = arith.constant 3.200000e+01 : f32
    %219 = vector.broadcast %cst_69 : f32 to vector<16x1xf32>
    %220 = arith.divf %218, %219 : vector<16x1xf32>
    %221 = vector.broadcast %213 : vector<16x1xf32> to vector<16x32xf32>
    %222 = arith.subf %209, %221 : vector<16x32xf32>
    %cst_70 = arith.constant 9.99999996E-13 : f32
    %223 = vector.broadcast %cst_70 : f32 to vector<16x1xf32>
    %224 = arith.addf %220, %223 : vector<16x1xf32>
    %225 = math.rsqrt %224 : vector<16x1xf32>
    %226 = vector.broadcast %225 : vector<16x1xf32> to vector<16x32xf32>
    %227 = arith.mulf %222, %226 : vector<16x32xf32>
    %228 = vector.broadcast %63 : vector<1x32xf32> to vector<16x32xf32>
    %229 = arith.mulf %227, %228 : vector<16x32xf32>
    %230 = vector.broadcast %64 : vector<1x32xf32> to vector<16x32xf32>
    %231 = arith.addf %229, %230 : vector<16x32xf32>
    %c1 = arith.constant 1 : index
    %c0_71 = arith.constant 0 : index
    %c0_72 = arith.constant 0 : index
    %232 = vector.load %arg11[%c1, %c0_71, %c0_72] : memref<2x8x96xf32, #tpu.memory_space<vmem>>, vector<1x8x96xf32>
    %233 = vector.shape_cast %232 : vector<1x8x96xf32> to vector<8x96xf32>
    %234 = vector.extract_strided_slice %233 {offsets = [0, 0], sizes = [1, 96], strides = [1, 1]} : vector<8x96xf32> to vector<1x96xf32>
    %235 = vector.extract_strided_slice %233 {offsets = [1, 0], sizes = [1, 32], strides = [1, 1]} : vector<8x96xf32> to vector<1x32xf32>
    %236 = vector.extract_strided_slice %233 {offsets = [2, 0], sizes = [1, 32], strides = [1, 1]} : vector<8x96xf32> to vector<1x32xf32>
    %237 = vector.extract_strided_slice %233 {offsets = [3, 0], sizes = [1, 32], strides = [1, 1]} : vector<8x96xf32> to vector<1x32xf32>
    %238 = vector.extract_strided_slice %233 {offsets = [4, 0], sizes = [1, 64], strides = [1, 1]} : vector<8x96xf32> to vector<1x64xf32>
    %239 = vector.extract_strided_slice %233 {offsets = [5, 0], sizes = [1, 32], strides = [1, 1]} : vector<8x96xf32> to vector<1x32xf32>
    %240 = vector.extract_strided_slice %233 {offsets = [6, 0], sizes = [1, 32], strides = [1, 1]} : vector<8x96xf32> to vector<1x32xf32>
    %241 = vector.extract_strided_slice %233 {offsets = [7, 0], sizes = [1, 32], strides = [1, 1]} : vector<8x96xf32> to vector<1x32xf32>
    %c1_73 = arith.constant 1 : index
    %c0_74 = arith.constant 0 : index
    %c0_75 = arith.constant 0 : index
    %242 = vector.load %arg7[%c1_73, %c0_74, %c0_75] : memref<2x32x96xbf16, #tpu.memory_space<vmem>>, vector<1x32x96xbf16>
    %243 = vector.shape_cast %242 : vector<1x32x96xbf16> to vector<32x96xbf16>
    %244 = arith.truncf %231 : vector<16x32xf32> to vector<16x32xbf16>
    %cst_76 = arith.constant dense<0.000000e+00> : vector<16x96xf32>
    %245 = tpu.matmul %244, %243, %cst_76 {dimension_numbers = #tpu.dot_dimension_numbers<[1], [0], [0], [1], [0, 0, 1, 1], [], []>} : vector<16x32xbf16>, vector<32x96xbf16>, vector<16x96xf32> -> vector<16x96xf32>
    %246 = vector.broadcast %234 : vector<1x96xf32> to vector<16x96xf32>
    %247 = arith.addf %245, %246 : vector<16x96xf32>
    %248 = vector.extract_strided_slice %247 {offsets = [0, 0], sizes = [16, 32], strides = [1, 1]} : vector<16x96xf32> to vector<16x32xf32>
    %249 = vector.extract_strided_slice %247 {offsets = [0, 32], sizes = [16, 32], strides = [1, 1]} : vector<16x96xf32> to vector<16x32xf32>
    %250 = vector.extract_strided_slice %247 {offsets = [0, 64], sizes = [16, 32], strides = [1, 1]} : vector<16x96xf32> to vector<16x32xf32>
    %251 = vector.extract_strided_slice %248 {offsets = [0, 0], sizes = [16, 8], strides = [1, 1]} : vector<16x32xf32> to vector<16x8xf32>
    %252 = vector.shape_cast %251 : vector<16x8xf32> to vector<2x8x8xf32>
    %253 = vector.extract_strided_slice %249 {offsets = [0, 0], sizes = [16, 8], strides = [1, 1]} : vector<16x32xf32> to vector<16x8xf32>
    %254 = vector.shape_cast %253 : vector<16x8xf32> to vector<2x8x8xf32>
    %255 = vector.extract_strided_slice %250 {offsets = [0, 0], sizes = [16, 8], strides = [1, 1]} : vector<16x32xf32> to vector<16x8xf32>
    %256 = vector.shape_cast %255 : vector<16x8xf32> to vector<2x8x8xf32>
    "tpu.trace_start"() <{level = 10 : i32, message = "bqd,bkd->bqk"}> : () -> ()
    %cst_77 = arith.constant dense<0.000000e+00> : vector<2x8x8xf32>
    %257 = tpu.matmul %252, %254, %cst_77 {dimension_numbers = #tpu.dot_dimension_numbers<[2], [2], [1], [1], [0, 0, 0, 1, 1, 1], [0], [0]>} : vector<2x8x8xf32>, vector<2x8x8xf32>, vector<2x8x8xf32> -> vector<2x8x8xf32>
    "tpu.trace_stop"() : () -> ()
    %258 = arith.addf %257, %54 : vector<2x8x8xf32>
    %cst_78 = arith.constant dense<0xFF800000> : vector<2x8xf32>
    %259 = vector.multi_reduction <maximumf>, %258, %cst_78 [2] : vector<2x8x8xf32> to vector<2x8xf32>
    %260 = vector.shape_cast %259 : vector<2x8xf32> to vector<2x8x1xf32>
    %261 = vector.broadcast %260 : vector<2x8x1xf32> to vector<2x8x8xf32>
    %262 = arith.subf %258, %261 : vector<2x8x8xf32>
    %263 = math.exp %262 : vector<2x8x8xf32>
    %cst_79 = arith.constant dense<0.000000e+00> : vector<2x8xf32>
    %264 = vector.multi_reduction <add>, %263, %cst_79 [2] : vector<2x8x8xf32> to vector<2x8xf32>
    %265 = vector.shape_cast %264 : vector<2x8xf32> to vector<2x8x1xf32>
    %266 = tpu.reciprocal %265 {approx = true} : vector<2x8x1xf32> -> vector<2x8x1xf32>
    %267 = vector.broadcast %266 : vector<2x8x1xf32> to vector<2x8x8xf32>
    %268 = arith.mulf %263, %267 : vector<2x8x8xf32>
    "tpu.trace_start"() <{level = 10 : i32, message = "bqk,bkd->bqd"}> : () -> ()
    %cst_80 = arith.constant dense<0.000000e+00> : vector<2x8x8xf32>
    %269 = tpu.matmul %268, %256, %cst_80 {dimension_numbers = #tpu.dot_dimension_numbers<[2], [1], [1], [2], [0, 0, 0, 1, 1, 2], [0], [0]>} : vector<2x8x8xf32>, vector<2x8x8xf32>, vector<2x8x8xf32> -> vector<2x8x8xf32>
    "tpu.trace_stop"() : () -> ()
    %270 = vector.shape_cast %269 : vector<2x8x8xf32> to vector<16x8xf32>
    %271 = vector.extract_strided_slice %248 {offsets = [0, 8], sizes = [16, 8], strides = [1, 1]} : vector<16x32xf32> to vector<16x8xf32>
    %272 = vector.shape_cast %271 : vector<16x8xf32> to vector<2x8x8xf32>
    %273 = vector.extract_strided_slice %249 {offsets = [0, 8], sizes = [16, 8], strides = [1, 1]} : vector<16x32xf32> to vector<16x8xf32>
    %274 = vector.shape_cast %273 : vector<16x8xf32> to vector<2x8x8xf32>
    %275 = vector.extract_strided_slice %250 {offsets = [0, 8], sizes = [16, 8], strides = [1, 1]} : vector<16x32xf32> to vector<16x8xf32>
    %276 = vector.shape_cast %275 : vector<16x8xf32> to vector<2x8x8xf32>
    "tpu.trace_start"() <{level = 10 : i32, message = "bqd,bkd->bqk"}> : () -> ()
    %cst_81 = arith.constant dense<0.000000e+00> : vector<2x8x8xf32>
    %277 = tpu.matmul %272, %274, %cst_81 {dimension_numbers = #tpu.dot_dimension_numbers<[2], [2], [1], [1], [0, 0, 0, 1, 1, 1], [0], [0]>} : vector<2x8x8xf32>, vector<2x8x8xf32>, vector<2x8x8xf32> -> vector<2x8x8xf32>
    "tpu.trace_stop"() : () -> ()
    %278 = arith.addf %277, %54 : vector<2x8x8xf32>
    %cst_82 = arith.constant dense<0xFF800000> : vector<2x8xf32>
    %279 = vector.multi_reduction <maximumf>, %278, %cst_82 [2] : vector<2x8x8xf32> to vector<2x8xf32>
    %280 = vector.shape_cast %279 : vector<2x8xf32> to vector<2x8x1xf32>
    %281 = vector.broadcast %280 : vector<2x8x1xf32> to vector<2x8x8xf32>
    %282 = arith.subf %278, %281 : vector<2x8x8xf32>
    %283 = math.exp %282 : vector<2x8x8xf32>
    %cst_83 = arith.constant dense<0.000000e+00> : vector<2x8xf32>
    %284 = vector.multi_reduction <add>, %283, %cst_83 [2] : vector<2x8x8xf32> to vector<2x8xf32>
    %285 = vector.shape_cast %284 : vector<2x8xf32> to vector<2x8x1xf32>
    %286 = tpu.reciprocal %285 {approx = true} : vector<2x8x1xf32> -> vector<2x8x1xf32>
    %287 = vector.broadcast %286 : vector<2x8x1xf32> to vector<2x8x8xf32>
    %288 = arith.mulf %283, %287 : vector<2x8x8xf32>
    "tpu.trace_start"() <{level = 10 : i32, message = "bqk,bkd->bqd"}> : () -> ()
    %cst_84 = arith.constant dense<0.000000e+00> : vector<2x8x8xf32>
    %289 = tpu.matmul %288, %276, %cst_84 {dimension_numbers = #tpu.dot_dimension_numbers<[2], [1], [1], [2], [0, 0, 0, 1, 1, 2], [0], [0]>} : vector<2x8x8xf32>, vector<2x8x8xf32>, vector<2x8x8xf32> -> vector<2x8x8xf32>
    "tpu.trace_stop"() : () -> ()
    %290 = vector.shape_cast %289 : vector<2x8x8xf32> to vector<16x8xf32>
    %291 = vector.extract_strided_slice %248 {offsets = [0, 16], sizes = [16, 8], strides = [1, 1]} : vector<16x32xf32> to vector<16x8xf32>
    %292 = vector.shape_cast %291 : vector<16x8xf32> to vector<2x8x8xf32>
    %293 = vector.extract_strided_slice %249 {offsets = [0, 16], sizes = [16, 8], strides = [1, 1]} : vector<16x32xf32> to vector<16x8xf32>
    %294 = vector.shape_cast %293 : vector<16x8xf32> to vector<2x8x8xf32>
    %295 = vector.extract_strided_slice %250 {offsets = [0, 16], sizes = [16, 8], strides = [1, 1]} : vector<16x32xf32> to vector<16x8xf32>
    %296 = vector.shape_cast %295 : vector<16x8xf32> to vector<2x8x8xf32>
    "tpu.trace_start"() <{level = 10 : i32, message = "bqd,bkd->bqk"}> : () -> ()
    %cst_85 = arith.constant dense<0.000000e+00> : vector<2x8x8xf32>
    %297 = tpu.matmul %292, %294, %cst_85 {dimension_numbers = #tpu.dot_dimension_numbers<[2], [2], [1], [1], [0, 0, 0, 1, 1, 1], [0], [0]>} : vector<2x8x8xf32>, vector<2x8x8xf32>, vector<2x8x8xf32> -> vector<2x8x8xf32>
    "tpu.trace_stop"() : () -> ()
    %298 = arith.addf %297, %54 : vector<2x8x8xf32>
    %cst_86 = arith.constant dense<0xFF800000> : vector<2x8xf32>
    %299 = vector.multi_reduction <maximumf>, %298, %cst_86 [2] : vector<2x8x8xf32> to vector<2x8xf32>
    %300 = vector.shape_cast %299 : vector<2x8xf32> to vector<2x8x1xf32>
    %301 = vector.broadcast %300 : vector<2x8x1xf32> to vector<2x8x8xf32>
    %302 = arith.subf %298, %301 : vector<2x8x8xf32>
    %303 = math.exp %302 : vector<2x8x8xf32>
    %cst_87 = arith.constant dense<0.000000e+00> : vector<2x8xf32>
    %304 = vector.multi_reduction <add>, %303, %cst_87 [2] : vector<2x8x8xf32> to vector<2x8xf32>
    %305 = vector.shape_cast %304 : vector<2x8xf32> to vector<2x8x1xf32>
    %306 = tpu.reciprocal %305 {approx = true} : vector<2x8x1xf32> -> vector<2x8x1xf32>
    %307 = vector.broadcast %306 : vector<2x8x1xf32> to vector<2x8x8xf32>
    %308 = arith.mulf %303, %307 : vector<2x8x8xf32>
    "tpu.trace_start"() <{level = 10 : i32, message = "bqk,bkd->bqd"}> : () -> ()
    %cst_88 = arith.constant dense<0.000000e+00> : vector<2x8x8xf32>
    %309 = tpu.matmul %308, %296, %cst_88 {dimension_numbers = #tpu.dot_dimension_numbers<[2], [1], [1], [2], [0, 0, 0, 1, 1, 2], [0], [0]>} : vector<2x8x8xf32>, vector<2x8x8xf32>, vector<2x8x8xf32> -> vector<2x8x8xf32>
    "tpu.trace_stop"() : () -> ()
    %310 = vector.shape_cast %309 : vector<2x8x8xf32> to vector<16x8xf32>
    %311 = vector.extract_strided_slice %248 {offsets = [0, 24], sizes = [16, 8], strides = [1, 1]} : vector<16x32xf32> to vector<16x8xf32>
    %312 = vector.shape_cast %311 : vector<16x8xf32> to vector<2x8x8xf32>
    %313 = vector.extract_strided_slice %249 {offsets = [0, 24], sizes = [16, 8], strides = [1, 1]} : vector<16x32xf32> to vector<16x8xf32>
    %314 = vector.shape_cast %313 : vector<16x8xf32> to vector<2x8x8xf32>
    %315 = vector.extract_strided_slice %250 {offsets = [0, 24], sizes = [16, 8], strides = [1, 1]} : vector<16x32xf32> to vector<16x8xf32>
    %316 = vector.shape_cast %315 : vector<16x8xf32> to vector<2x8x8xf32>
    "tpu.trace_start"() <{level = 10 : i32, message = "bqd,bkd->bqk"}> : () -> ()
    %cst_89 = arith.constant dense<0.000000e+00> : vector<2x8x8xf32>
    %317 = tpu.matmul %312, %314, %cst_89 {dimension_numbers = #tpu.dot_dimension_numbers<[2], [2], [1], [1], [0, 0, 0, 1, 1, 1], [0], [0]>} : vector<2x8x8xf32>, vector<2x8x8xf32>, vector<2x8x8xf32> -> vector<2x8x8xf32>
    "tpu.trace_stop"() : () -> ()
    %318 = arith.addf %317, %54 : vector<2x8x8xf32>
    %cst_90 = arith.constant dense<0xFF800000> : vector<2x8xf32>
    %319 = vector.multi_reduction <maximumf>, %318, %cst_90 [2] : vector<2x8x8xf32> to vector<2x8xf32>
    %320 = vector.shape_cast %319 : vector<2x8xf32> to vector<2x8x1xf32>
    %321 = vector.broadcast %320 : vector<2x8x1xf32> to vector<2x8x8xf32>
    %322 = arith.subf %318, %321 : vector<2x8x8xf32>
    %323 = math.exp %322 : vector<2x8x8xf32>
    %cst_91 = arith.constant dense<0.000000e+00> : vector<2x8xf32>
    %324 = vector.multi_reduction <add>, %323, %cst_91 [2] : vector<2x8x8xf32> to vector<2x8xf32>
    %325 = vector.shape_cast %324 : vector<2x8xf32> to vector<2x8x1xf32>
    %326 = tpu.reciprocal %325 {approx = true} : vector<2x8x1xf32> -> vector<2x8x1xf32>
    %327 = vector.broadcast %326 : vector<2x8x1xf32> to vector<2x8x8xf32>
    %328 = arith.mulf %323, %327 : vector<2x8x8xf32>
    "tpu.trace_start"() <{level = 10 : i32, message = "bqk,bkd->bqd"}> : () -> ()
    %cst_92 = arith.constant dense<0.000000e+00> : vector<2x8x8xf32>
    %329 = tpu.matmul %328, %316, %cst_92 {dimension_numbers = #tpu.dot_dimension_numbers<[2], [1], [1], [2], [0, 0, 0, 1, 1, 2], [0], [0]>} : vector<2x8x8xf32>, vector<2x8x8xf32>, vector<2x8x8xf32> -> vector<2x8x8xf32>
    "tpu.trace_stop"() : () -> ()
    %330 = vector.shape_cast %329 : vector<2x8x8xf32> to vector<16x8xf32>
    %331 = tpu.concatenate %270, %290, %310, %330 in 1 : vector<16x8xf32>, vector<16x8xf32>, vector<16x8xf32>, vector<16x8xf32> -> vector<16x32xf32>
    %c1_93 = arith.constant 1 : index
    %c0_94 = arith.constant 0 : index
    %c0_95 = arith.constant 0 : index
    %332 = vector.load %arg8[%c1_93, %c0_94, %c0_95] : memref<2x32x32xbf16, #tpu.memory_space<vmem>>, vector<1x32x32xbf16>
    %333 = vector.shape_cast %332 : vector<1x32x32xbf16> to vector<32x32xbf16>
    %334 = arith.truncf %331 : vector<16x32xf32> to vector<16x32xbf16>
    %cst_96 = arith.constant dense<0.000000e+00> : vector<16x32xf32>
    %335 = tpu.matmul %334, %333, %cst_96 {dimension_numbers = #tpu.dot_dimension_numbers<[1], [0], [0], [1], [0, 0, 1, 1], [], []>} : vector<16x32xbf16>, vector<32x32xbf16>, vector<16x32xf32> -> vector<16x32xf32>
    %336 = vector.broadcast %235 : vector<1x32xf32> to vector<16x32xf32>
    %337 = arith.addf %335, %336 : vector<16x32xf32>
    %338 = arith.addf %231, %337 : vector<16x32xf32>
    %cst_97 = arith.constant dense<0.000000e+00> : vector<16xf32>
    %339 = vector.multi_reduction <add>, %338, %cst_97 [1] : vector<16x32xf32> to vector<16xf32>
    %340 = vector.shape_cast %339 : vector<16xf32> to vector<16x1xf32>
    %cst_98 = arith.constant 3.200000e+01 : f32
    %341 = vector.broadcast %cst_98 : f32 to vector<16x1xf32>
    %342 = arith.divf %340, %341 : vector<16x1xf32>
    %343 = vector.broadcast %342 : vector<16x1xf32> to vector<16x32xf32>
    %344 = arith.subf %338, %343 : vector<16x32xf32>
    %345 = arith.mulf %344, %344 : vector<16x32xf32>
    %cst_99 = arith.constant dense<0.000000e+00> : vector<16xf32>
    %346 = vector.multi_reduction <add>, %345, %cst_99 [1] : vector<16x32xf32> to vector<16xf32>
    %347 = vector.shape_cast %346 : vector<16xf32> to vector<16x1xf32>
    %cst_100 = arith.constant 3.200000e+01 : f32
    %348 = vector.broadcast %cst_100 : f32 to vector<16x1xf32>
    %349 = arith.divf %347, %348 : vector<16x1xf32>
    %350 = vector.broadcast %342 : vector<16x1xf32> to vector<16x32xf32>
    %351 = arith.subf %338, %350 : vector<16x32xf32>
    %cst_101 = arith.constant 9.99999996E-13 : f32
    %352 = vector.broadcast %cst_101 : f32 to vector<16x1xf32>
    %353 = arith.addf %349, %352 : vector<16x1xf32>
    %354 = math.rsqrt %353 : vector<16x1xf32>
    %355 = vector.broadcast %354 : vector<16x1xf32> to vector<16x32xf32>
    %356 = arith.mulf %351, %355 : vector<16x32xf32>
    %357 = vector.broadcast %236 : vector<1x32xf32> to vector<16x32xf32>
    %358 = arith.mulf %356, %357 : vector<16x32xf32>
    %359 = vector.broadcast %237 : vector<1x32xf32> to vector<16x32xf32>
    %360 = arith.addf %358, %359 : vector<16x32xf32>
    %c1_102 = arith.constant 1 : index
    %c0_103 = arith.constant 0 : index
    %c0_104 = arith.constant 0 : index
    %361 = vector.load %arg9[%c1_102, %c0_103, %c0_104] : memref<2x32x64xbf16, #tpu.memory_space<vmem>>, vector<1x32x64xbf16>
    %362 = vector.shape_cast %361 : vector<1x32x64xbf16> to vector<32x64xbf16>
    %363 = arith.truncf %360 : vector<16x32xf32> to vector<16x32xbf16>
    %cst_105 = arith.constant dense<0.000000e+00> : vector<16x64xf32>
    %364 = tpu.matmul %363, %362, %cst_105 {dimension_numbers = #tpu.dot_dimension_numbers<[1], [0], [0], [1], [0, 0, 1, 1], [], []>} : vector<16x32xbf16>, vector<32x64xbf16>, vector<16x64xf32> -> vector<16x64xf32>
    %365 = vector.broadcast %238 : vector<1x64xf32> to vector<16x64xf32>
    %366 = arith.addf %364, %365 : vector<16x64xf32>
    %cst_106 = arith.constant 5.000000e-01 : f32
    %367 = vector.broadcast %cst_106 : f32 to vector<16x64xf32>
    %368 = arith.mulf %367, %366 : vector<16x64xf32>
    %cst_107 = arith.constant 4.471500e-02 : f32
    %369 = vector.broadcast %cst_107 : f32 to vector<16x64xf32>
    %370 = arith.mulf %369, %366 : vector<16x64xf32>
    %371 = arith.mulf %370, %366 : vector<16x64xf32>
    %372 = arith.mulf %371, %366 : vector<16x64xf32>
    %373 = arith.addf %366, %372 : vector<16x64xf32>
    %cst_108 = arith.constant 0.797884583 : f32
    %374 = vector.broadcast %cst_108 : f32 to vector<16x64xf32>
    %375 = arith.mulf %374, %373 : vector<16x64xf32>
    %376 = math.tanh %375 : vector<16x64xf32>
    %cst_109 = arith.constant 1.000000e+00 : f32
    %377 = vector.broadcast %cst_109 : f32 to vector<16x64xf32>
    %378 = arith.addf %377, %376 : vector<16x64xf32>
    %379 = arith.mulf %368, %378 : vector<16x64xf32>
    %c1_110 = arith.constant 1 : index
    %c0_111 = arith.constant 0 : index
    %c0_112 = arith.constant 0 : index
    %380 = vector.load %arg10[%c1_110, %c0_111, %c0_112] : memref<2x64x32xbf16, #tpu.memory_space<vmem>>, vector<1x64x32xbf16>
    %381 = vector.shape_cast %380 : vector<1x64x32xbf16> to vector<64x32xbf16>
    %382 = arith.truncf %379 : vector<16x64xf32> to vector<16x64xbf16>
    %cst_113 = arith.constant dense<0.000000e+00> : vector<16x32xf32>
    %383 = tpu.matmul %382, %381, %cst_113 {dimension_numbers = #tpu.dot_dimension_numbers<[1], [0], [0], [1], [0, 0, 1, 1], [], []>} : vector<16x64xbf16>, vector<64x32xbf16>, vector<16x32xf32> -> vector<16x32xf32>
    %384 = vector.broadcast %239 : vector<1x32xf32> to vector<16x32xf32>
    %385 = arith.addf %383, %384 : vector<16x32xf32>
    %386 = arith.addf %360, %385 : vector<16x32xf32>
    %cst_114 = arith.constant dense<0.000000e+00> : vector<16xf32>
    %387 = vector.multi_reduction <add>, %386, %cst_114 [1] : vector<16x32xf32> to vector<16xf32>
    %388 = vector.shape_cast %387 : vector<16xf32> to vector<16x1xf32>
    %cst_115 = arith.constant 3.200000e+01 : f32
    %389 = vector.broadcast %cst_115 : f32 to vector<16x1xf32>
    %390 = arith.divf %388, %389 : vector<16x1xf32>
    %391 = vector.broadcast %390 : vector<16x1xf32> to vector<16x32xf32>
    %392 = arith.subf %386, %391 : vector<16x32xf32>
    %393 = arith.mulf %392, %392 : vector<16x32xf32>
    %cst_116 = arith.constant dense<0.000000e+00> : vector<16xf32>
    %394 = vector.multi_reduction <add>, %393, %cst_116 [1] : vector<16x32xf32> to vector<16xf32>
    %395 = vector.shape_cast %394 : vector<16xf32> to vector<16x1xf32>
    %cst_117 = arith.constant 3.200000e+01 : f32
    %396 = vector.broadcast %cst_117 : f32 to vector<16x1xf32>
    %397 = arith.divf %395, %396 : vector<16x1xf32>
    %398 = vector.broadcast %390 : vector<16x1xf32> to vector<16x32xf32>
    %399 = arith.subf %386, %398 : vector<16x32xf32>
    %cst_118 = arith.constant 9.99999996E-13 : f32
    %400 = vector.broadcast %cst_118 : f32 to vector<16x1xf32>
    %401 = arith.addf %397, %400 : vector<16x1xf32>
    %402 = math.rsqrt %401 : vector<16x1xf32>
    %403 = vector.broadcast %402 : vector<16x1xf32> to vector<16x32xf32>
    %404 = arith.mulf %399, %403 : vector<16x32xf32>
    %405 = vector.broadcast %240 : vector<1x32xf32> to vector<16x32xf32>
    %406 = arith.mulf %404, %405 : vector<16x32xf32>
    %407 = vector.broadcast %241 : vector<1x32xf32> to vector<16x32xf32>
    %408 = arith.addf %406, %407 : vector<16x32xf32>
    %c0_119 = arith.constant 0 : index
    %c0_120 = arith.constant 0 : index
    %409 = vector.load %arg12[%c0_119, %c0_120] : memref<32x32xbf16, #tpu.memory_space<vmem>>, vector<32x32xbf16>
    %410 = arith.truncf %408 : vector<16x32xf32> to vector<16x32xbf16>
    %cst_121 = arith.constant dense<0.000000e+00> : vector<16x32xf32>
    %411 = tpu.matmul %410, %409, %cst_121 {dimension_numbers = #tpu.dot_dimension_numbers<[1], [0], [0], [1], [0, 0, 1, 1], [], []>} : vector<16x32xbf16>, vector<32x32xbf16>, vector<16x32xf32> -> vector<16x32xf32>
    %412 = vector.broadcast %3 : vector<1x32xf32> to vector<16x32xf32>
    %413 = arith.addf %411, %412 : vector<16x32xf32>
    %414 = math.tanh %413 : vector<16x32xf32>
    %c0_122 = arith.constant 0 : index
    %c0_123 = arith.constant 0 : index
    %415 = vector.load %arg13[%c0_122, %c0_123] : memref<32x128xbf16, #tpu.memory_space<vmem>>, vector<32x128xbf16>
    %416 = arith.truncf %414 : vector<16x32xf32> to vector<16x32xbf16>
    %cst_124 = arith.constant dense<0.000000e+00> : vector<16x128xf32>
    %417 = tpu.matmul %416, %415, %cst_124 {dimension_numbers = #tpu.dot_dimension_numbers<[1], [0], [0], [1], [0, 0, 1, 1], [], []>} : vector<16x32xbf16>, vector<32x128xbf16>, vector<16x128xf32> -> vector<16x128xf32>
    %418 = vector.broadcast %4 : vector<1x128xf32> to vector<16x128xf32>
    %419 = arith.addf %417, %418 : vector<16x128xf32>
    %c0_125 = arith.constant 0 : index
    %c0_126 = arith.constant 0 : index
    %420 = vector.load %arg15[%c0_125, %c0_126] : memref<16x128xf32, #tpu.memory_space<vmem>>, vector<16x128xf32>
    tpu.vector_store %arg15[%c0_125, %c0_126], %419 {strides = array<i32>} : memref<16x128xf32, #tpu.memory_space<vmem>>, vector<16x128xf32>,
    return
  }
  func.func @transform_0(%arg0: i32) -> (i32, i32) {
    %c0_i32 = arith.constant 0 : i32
    %c0_i32_0 = arith.constant 0 : i32
    %c0_i32_1 = arith.constant 0 : i32
    return %c0_i32, %c0_i32_0 : i32, i32
  }
  func.func @transform_1(%arg0: i32) -> (i32, i32) {
    %c0_i32 = arith.constant 0 : i32
    %c0_i32_0 = arith.constant 0 : i32
    %c0_i32_1 = arith.constant 0 : i32
    return %c0_i32, %c0_i32_0 : i32, i32
  }
  func.func @transform_2(%arg0: i32) -> (i32, i32, i32) {
    %c0_i32 = arith.constant 0 : i32
    %c0_i32_0 = arith.constant 0 : i32
    %c0_i32_1 = arith.constant 0 : i32
    %c0_i32_2 = arith.constant 0 : i32
    return %c0_i32, %c0_i32_0, %c0_i32_1 : i32, i32, i32
  }
  func.func @transform_3(%arg0: i32) -> (i32, i32) {
    %c0_i32 = arith.constant 0 : i32
    %c0_i32_0 = arith.constant 0 : i32
    %c0_i32_1 = arith.constant 0 : i32
    return %c0_i32, %c0_i32_0 : i32, i32
  }
  func.func @transform_4(%arg0: i32) -> (i32, i32) {
    %c0_i32 = arith.constant 0 : i32
    %c0_i32_0 = arith.constant 0 : i32
    %c0_i32_1 = arith.constant 0 : i32
    return %c0_i32, %c0_i32_0 : i32, i32
  }
  func.func @transform_5(%arg0: i32) -> (i32, i32) {
    %c0_i32 = arith.constant 0 : i32
    %c0_i32_0 = arith.constant 0 : i32
    %c0_i32_1 = arith.constant 0 : i32
    return %c0_i32, %c0_i32_0 : i32, i32
  }
  func.func @transform_6(%arg0: i32) -> (i32, i32, i32) {
    %c0_i32 = arith.constant 0 : i32
    %c0_i32_0 = arith.constant 0 : i32
    %c0_i32_1 = arith.constant 0 : i32
    %c0_i32_2 = arith.constant 0 : i32
    return %c0_i32, %c0_i32_0, %c0_i32_1 : i32, i32, i32
  }
  func.func @transform_7(%arg0: i32) -> (i32, i32, i32) {
    %c0_i32 = arith.constant 0 : i32
    %c0_i32_0 = arith.constant 0 : i32
    %c0_i32_1 = arith.constant 0 : i32
    %c0_i32_2 = arith.constant 0 : i32
    return %c0_i32, %c0_i32_0, %c0_i32_1 : i32, i32, i32
  }
  func.func @transform_8(%arg0: i32) -> (i32, i32, i32) {
    %c0_i32 = arith.constant 0 : i32
    %c0_i32_0 = arith.constant 0 : i32
    %c0_i32_1 = arith.constant 0 : i32
    %c0_i32_2 = arith.constant 0 : i32
    return %c0_i32, %c0_i32_0, %c0_i32_1 : i32, i32, i32
  }
  func.func @transform_9(%arg0: i32) -> (i32, i32, i32) {
    %c0_i32 = arith.constant 0 : i32
    %c0_i32_0 = arith.constant 0 : i32
    %c0_i32_1 = arith.constant 0 : i32
    %c0_i32_2 = arith.constant 0 : i32
    return %c0_i32, %c0_i32_0, %c0_i32_1 : i32, i32, i32
  }
  func.func @transform_10(%arg0: i32) -> (i32, i32, i32) {
    %c0_i32 = arith.constant 0 : i32
    %c0_i32_0 = arith.constant 0 : i32
    %c0_i32_1 = arith.constant 0 : i32
    %c0_i32_2 = arith.constant 0 : i32
    return %c0_i32, %c0_i32_0, %c0_i32_1 : i32, i32, i32
  }
  func.func @transform_11(%arg0: i32) -> (i32, i32) {
    %c0_i32 = arith.constant 0 : i32
    %c0_i32_0 = arith.constant 0 : i32
    %c0_i32_1 = arith.constant 0 : i32
    return %c0_i32, %c0_i32_0 : i32, i32
  }
  func.func @transform_12(%arg0: i32) -> (i32, i32) {
    %c0_i32 = arith.constant 0 : i32
    %c0_i32_0 = arith.constant 0 : i32
    %c0_i32_1 = arith.constant 0 : i32
    return %c0_i32, %c0_i32_0 : i32, i32
  }
  func.func @transform_13(%arg0: i32) -> (i32, i32) {
    %c0_i32 = arith.constant 0 : i32
    %c0_i32_0 = arith.constant 0 : i32
    %c0_i32_1 = arith.constant 0 : i32
    return %c0_i32, %c0_i32_0 : i32, i32
  }
  func.func @transform_14(%arg0: i32) -> (i32, i32) {
    %c0_i32 = arith.constant 0 : i32
    %c0_i32_0 = arith.constant 0 : i32
    %c0_i32_1 = arith.constant 0 : i32
    return %c0_i32, %c0_i32_0 : i32, i32
  }
}

</mosaic_0001>

<bundles_post_ra>
// kernel: bert_type_classification_forward.1
= control target key start
LH: loop header
LB: loop body
LE: loop exit
PB: predicated region body
PF: predicated region fallthrough
CT: control target
= control target key end

     0   :  { %vm100_vm0 = vcmask 1041408   ;;  %v2359_v0 = vmov 0   ;;  %vm135_vm1 = vcmask 1043456   ;;  %v51_v19 = vlaneseq  ;;  %s2362_s19 = smov 96   ;;  %s2363_s20 = smov 120   ;;  %s2924_s1 = inlined_call_operand.vmem [shape: s32[16,1], index: 1, kind: input, shape index: {}]   ;;  %s2925_s0 = inlined_call_operand.vmem [shape: s32[16,1], index: 0, kind: input, shape index: {}]   ;;  %s2926_s5 = inlined_call_operand.vmem [shape: f32[2,32], index: 5, kind: input, shape index: {}]   ;;  %s2927_s3 = inlined_call_operand.vmem [shape: f32[100,32], index: 3, kind: input, shape index: {}]   ;;  %s2928_s4 = inlined_call_operand.vmem [shape: f32[16,32], index: 4, kind: input, shape index: {}]   ;;  %s2929_s6 = inlined_call_operand.vmem [shape: bf16[2,32,96], index: 6, kind: input, shape index: {}]   ;;  %s2930_s13 = inlined_call_operand.vmem [shape: f32[4,128], index: 13, kind: input, shape index: {}]   ;;  %s2931_s10 = inlined_call_operand.vmem [shape: f32[2,8,96], index: 10, kind: input, shape index: {}]   ;;  %s2932_s2 = inlined_call_operand.vmem [shape: s32[2,1,8], index: 2, kind: input, shape index: {}]   ;;  %s2933_s7 = inlined_call_operand.vmem [shape: bf16[2,32,32], index: 7, kind: input, shape index: {}]   ;;  %s2934_s8 = inlined_call_operand.vmem [shape: bf16[2,32,64], index: 8, kind: input, shape index: {}]   ;;  %s2935_s9 = inlined_call_operand.vmem [shape: bf16[2,64,32], index: 9, kind: input, shape index: {}]   ;;  %s2936_s11 = inlined_call_operand.vmem [shape: bf16[32,32], index: 11, kind: input, shape index: {}]   ;;  %s2937_s12 = inlined_call_operand.vmem [shape: bf16[32,128], index: 12, kind: input, shape index: {}]   ;;  %s2938_s14 = inlined_call_operand.vmem [shape: f32[16,128], index: 14, kind: output, shape index: {}]  }
   0x1   :  { %2203 = vset.pattern.permute.xlu0 %v2359_v0  ;;  %v78_v1 = vld [vmem:[%s2924_s1] sm:$0xff]  ;;  %2204 = vset.pattern.permute.xlu1 %v2359_v0  ;;  %v76_v5 = vld [vmem:[%s2927_s3 + $0x58] sm:$0xff]  ;;  %v75_v6 = vld [vmem:[%s2927_s3 + $0x50] sm:$0xff]  ;;  %vm93_vm2 = vcmask 15360   ;;  %v2360_v22 = vmov 0.0   ;;  %vm128_vm6 = vcmask 818176  }
   0x2   :  { %v49_v2 = vld [vmem:[%s2925_s0] sm:$0xff]  ;;  %81 = vperm.xlu0 %2203, %v78_v1   ;;  %v79_v7 = vld [vmem:[%s2924_s1 + $0x8] sm:$0xff]  ;;  %v72_v11 = vld [vmem:[%s2927_s3 + $0x38] sm:$0xff]  ;;  %v52_v20 = vand.u32 127, %v51_v19  ;;  %vm164_vm8 = vcmask 261120   ;;  %v2361_v41 = vmov 32.0  }
   0x3   :  { %54 = vperm.xlu1 %2204, %v49_v2   ;;  %v92_v3 = vld [vmem:[%s2926_s5] sm:$0x3]  ;;  %v50_v8 = vld [vmem:[%s2925_s0 + $0x8] sm:$0xff]  ;;  %v71_v12 = vld [vmem:[%s2927_s3 + $0x30] sm:$0xff]  ;;  %2260 = vrcp.f32 %v2361_v41  ;;  %s2364_s23 = smov 88   ;;  %s2365_s24 = smov 64  }
   0x4   :  { %v77_v4 = vld [vmem:[%s2927_s3 + $0x60] sm:$0xf]  ;;  %1981 = vmatpush.msk.msra.mxu1 %vm100_vm0, %v92_v3  ;;  %v74_v9 = vld [vmem:[%s2927_s3 + $0x48] sm:$0xff]  ;;  %v68_v15 = vld [vmem:[%s2927_s3 + $0x18] sm:$0xff]  ;;  %vm275_vm0 = vcmask 64512   ;;  %s2366_s5 = smov 80  }
   0x5   :  { %v73_v10 = vld [vmem:[%s2927_s3 + $0x40] sm:$0xff]  ;;  %v70_v13 = vld [vmem:[%s2927_s3 + $0x28] sm:$0xff]  ;;  %v67_v16 = vld [vmem:[%s2927_s3 + $0x10] sm:$0xff]  ;;  %s2368_s27 = smov 56   ;;  %s2369_s28 = smov 112  }
   0x6   :  { %1984 = vmatpush.msk.msrb.mxu1 %vm135_vm1, %v77_v4  ;;  %v69_v14 = vld [vmem:[%s2927_s3 + $0x20] sm:$0xff]  ;;  %v66_v17 = vld [vmem:[%s2927_s3 + $0x8] sm:$0xff]  ;;  %s2371_s29 = smov 40   ;;  %s2373_s30 = smov 8   ;;  %vm817_vm1 = vcmask 130048  }
   0x7   :  { %v65_v18 = vld [vmem:[%s2927_s3] sm:$0xff]  ;;  %v2163_v58 = vld [vmem:[%s2929_s6 + $0x8] sm:$0xff]  ;;  %s2370_s3 = smov 104   ;;  %s2374_s15 = smov 16  }
   0x8   :  { %143 = vmatpush.msrb.mxu1 %v76_v5  ;;  %v127_v32 = vld [vmem:[%s2928_s4] sm:$0xff]  ;;  %264 = vmatpush.bf16.msra.mxu2 %v2163_v58  ;;  %s2372_s4 = smov 48   ;;  %s2375_s16 = smov 24  }
   0x9   :  { %v2261_v42 = vpop.eup %2260  ;;  %v2162_v60 = vld [vmem:[%s2929_s6] sm:$0xff] }
   0xa   :  { %144 = vmatpush.msrb.mxu1 %v75_v6  ;;  %84 = vperm.xlu0 %2203, %v79_v7   ;;  %v172_v43 = vmul.f32 32.0, %v2261_v42  ;;  %vm176_vm9 = vweird.f32 %v2261_v42 }
   0xb   :  { %57 = vperm.xlu1 %2204, %v50_v8  }
   0xc   :  { %145 = vmatpush.msrb.mxu1 %v74_v9  ;;  %v173_v44 = vsub.f32 1.0, %v172_v43  ;;  %265 = vmatpush.bf16.msra.mxu2 %v2162_v60 }
   0xe   :  { %146 = vmatpush.msrb.mxu1 %v73_v10  ;;  %v174_v45 = vmul.f32 %v2261_v42, %v173_v44 }
  0x10   :  { %147 = vmatpush.msrb.mxu1 %v72_v11  ;;  %v175_v46 = vadd.f32 %v2261_v42, %v174_v45 }
  0x12   :  { %148 = vmatpush.msrb.mxu1 %v71_v12  ;;  %v2510_v47 = vsel %vm176_vm9, %v2261_v42, %v175_v46 }
  0x14   :  { %149 = vmatpush.msrb.mxu1 %v70_v13  ;;  %v48_v13 = vld [vmem:[%s2930_s13] sm:$0xf] }
  0x16   :  { %150 = vmatpush.msrb.mxu1 %v69_v14 }
  0x18   :  { %151 = vmatpush.msrb.mxu1 %v68_v15 }
  0x1a   :  { %152 = vmatpush.msrb.mxu1 %v67_v16  ;;  %v216_v16 = vperm.slane %v48_v13, 0 }
  0x1c   :  { %153 = vmatpush.msrb.mxu1 %v66_v17 }
  0x1e   :  { %154 = vmatpush.msrb.mxu1 %v65_v18 }
  0x74   :  { %v82_v21 = vpop.permute.xlu0 %81 }
  0x75   :  { %vm86_vm3 = vcmp.eq.s32.totalorder %v82_v21, %v52_v20  ;;  %v55_v26 = vpop.permute.xlu1 %54  ;;  %v219_v21 = vperm.slane %v48_v13, 1 }
  0x76   :  { %v1979_v23 = vsel %vm86_vm3, 1.0, %v2360_v22  ;;  %vm59_vm5 = vcmp.eq.s32.totalorder %v55_v26, %v52_v20  ;;  %v2537_v26 = vld [vmem:[%s2931_s10] sm:$0xff] }
  0x77   :  { %1982 = vmatmul.msk.f32.vlgmr.msra.gmra.mxu1 %vm93_vm2, %v1979_v23  ;;  %v1977_v27 = vsel %vm59_vm5, 1.0, %v2360_v22 }
  0x7c   :  { %v85_v24 = vpop.permute.xlu0 %84 }
  0x7d   :  { %vm87_vm4 = vcmp.eq.s32.totalorder %v85_v24, %v52_v20  ;;  %v58_v28 = vpop.permute.xlu1 %57 }
  0x7e   :  { %v1980_v25 = vsel %vm87_vm4, 1.0, %v2360_v22  ;;  %vm60_vm7 = vcmp.eq.s32.totalorder %v58_v28, %v52_v20 }
  0x7f   :  { %1983 = vmatmul.msk.f32.gmra.mxu1 %vm93_vm2, %v1980_v25  ;;  %v1978_v29 = vsel %vm60_vm7, 1.0, %v2360_v22  ;;  %vm820_vm2 = vcmask 195584  }
  0x87   :  { %1985 = vmatmul.msk.f32.vlgmr.msrb.gmra.mxu1 %vm128_vm6, %v1977_v27  ;;  %v242_v27 = vperm.slane %v2537_v26, 0 }
  0x8f   :  { %1986 = vmatmul.msk.f32.gmra.mxu1 %vm128_vm6, %v1978_v29 }
  0xf4   :  { %v121_v30 = vpop.f32.mrf.mxu1 }
  0xfc   :  { %v124_v31 = vpop.f32.mrf.mxu1 }
 0x104   :  { %v156_v33 = vpop.f32.mrf.mxu1 }
 0x105   :  { %v157_v34 = vadd.f32 %v156_v33, %v127_v32 }
 0x107   :  { %v162_v35 = vadd.f32 %v157_v34, %v121_v30  ;;  %v222_v34 = vld [vmem:[%s2932_s2] sm:$0x1] }
 0x109   :  { %v165_v36 = vsel %vm164_vm8, %v162_v35, 0.0 }
 0x10a   :  { %166 = vadd.xlane.f32.xlu2 %v165_v36 }
 0x10c   :  { %v159_v37 = vpop.f32.mrf.mxu1 }
 0x10d   :  { %v160_v38 = vadd.f32 %v159_v37, %v127_v32 }
 0x10f   :  { %v163_v39 = vadd.f32 %v160_v38, %v124_v31 }
 0x111   :  { %v168_v40 = vsel %vm164_vm8, %v163_v39, 0.0 }
 0x112   :  { %169 = vadd.xlane.f32.xlu2 %v168_v40 }
 0x17d   :  { %v167_v48 = vpop.xlane.xlu2 %166 }
 0x17e   :  { %v178_v49 = vmul.f32 %v2510_v47, %v167_v48  ;;  %v223_v48 = vld [vmem:[%s2932_s2 + $0x1] sm:$0x1]  ;;  %s2367_s2 = smov 72  }
 0x180   :  { %v180_v50 = vsub.f32 %v162_v35, %v178_v49  ;;  %v224_v35 = vcvt.s32.f32 %v222_v34  ;;  %v225_v49 = vcvt.s32.f32 %v223_v48 }
 0x182   :  { %v182_v51 = vmul.f32 %v180_v50, %v180_v50  ;;  %v226_v36 = vsub.f32 1.0, %v224_v35 }
 0x184   :  { %v184_v52 = vsel %vm164_vm8, %v182_v51, 0.0  ;;  %v228_v37 = vmul.f32 -1e+09, %v226_v36 }
 0x185   :  { %185 = vadd.xlane.f32.xlu0 %v184_v52  ;;  %v170_v53 = vpop.xlane.xlu2 %169 }
 0x186   :  { %v179_v54 = vmul.f32 %v2510_v47, %v170_v53  ;;  %v2559_v38 = vperm.slane %v228_v37, 0 }
 0x188   :  { %v181_v55 = vsub.f32 %v163_v39, %v179_v54 }
 0x18a   :  { %v183_v56 = vmul.f32 %v181_v55, %v181_v55 }
 0x18c   :  { %v187_v57 = vsel %vm164_vm8, %v183_v56, 0.0 }
 0x18d   :  { %188 = vadd.xlane.f32.xlu1 %v187_v57 }
 0x1f8   :  { %v186_v59 = vpop.xlane.xlu0 %185 }
 0x1f9   :  { %v190_v61 = vmul.f32 %v186_v59, %v2510_v47 }
 0x1fb   :  { %v192_v62 = vadd.f32 1e-12, %v190_v61 }
 0x1fd   :  { %2262 = vrsqrt.f32 %v192_v62  ;;  %vm200_vm11 = vweird.f32 %v192_v62 }
 0x200   :  { %v189_v63 = vpop.xlane.xlu1 %188 }
 0x201   :  { %v191_v0 = vmul.f32 %v189_v63, %v2510_v47 }
 0x203   :  { %v2263_v1 = vpop.eup %2262  ;;  %v193_v2 = vadd.f32 1e-12, %v191_v0 }
 0x204   :  { %v195_v3 = vmul.f32 %v2263_v1, %v192_v62  ;;  %vm201_vm10 = vweird.f32 %v2263_v1 }
 0x205   :  { %2264 = vrsqrt.f32 %v193_v2  ;;  %vm202_vm12 = vmor %vm200_vm11, %vm201_vm10  ;;  %vm210_vm14 = vweird.f32 %v193_v2  ;;  %vm997_vm10 = vcmask 523264  }
 0x206   :  { %v196_v4 = vmul.f32 %v2263_v1, %v195_v3 }
 0x208   :  { %v197_v5 = vmul.f32 0.5, %v196_v4 }
 0x20a   :  { %v198_v6 = vsub.f32 1.5, %v197_v5 }
 0x20b   :  { %v2265_v7 = vpop.eup %2264 }
 0x20c   :  { %v199_v8 = vmul.f32 %v2263_v1, %v198_v6  ;;  %v205_v9 = vmul.f32 %v2265_v7, %v193_v2  ;;  %vm211_vm13 = vweird.f32 %v2265_v7 }
 0x20d   :  { %vm212_vm15 = vmor %vm210_vm14, %vm211_vm13 }
 0x20e   :  { %v206_v10 = vmul.f32 %v2265_v7, %v205_v9  ;;  %v203_v11 = vsel %vm202_vm12, %v2263_v1, %v199_v8 }
 0x20f   :  { %v214_v15 = vmul.f32 %v203_v11, %v180_v50  ;;  %v227_v50 = vsub.f32 1.0, %v225_v49 }
 0x210   :  { %v207_v12 = vmul.f32 0.5, %v206_v10 }
 0x211   :  { %v217_v20 = vmul.f32 %v216_v16, %v214_v15  ;;  %v229_v51 = vmul.f32 -1e+09, %v227_v50 }
 0x212   :  { %v208_v14 = vsub.f32 1.5, %v207_v12 }
 0x213   :  { %v2527_v23 = vadd.f32 %v219_v21, %v217_v20  ;;  %v2571_v52 = vperm.slane %v229_v51, 0 }
 0x214   :  { %v209_v17 = vmul.f32 %v2265_v7, %v208_v14 }
 0x216   :  { %v213_v18 = vsel %vm212_vm15, %v2265_v7, %v209_v17 }
 0x217   :  { %v215_v19 = vmul.f32 %v213_v18, %v181_v55 }
 0x219   :  { %v218_v22 = vmul.f32 %v216_v16, %v215_v19 }
 0x21b   :  { %v2529_v24 = vadd.f32 %v219_v21, %v218_v22 }
 0x21d   :  { %v241_v25 = vpack.c.bf16 %v2529_v24, %v2527_v23 }
 0x21f   :  { %1995 = vmatmul.msk.bf16.vlgmr.msra.gmra.mxu2 %vm164_vm8, %v241_v25 }
 0x2a2   :  { %v267_v28 = vpop.f32.mrf.mxu2 }
 0x2a3   :  { %v2540_v29 = vadd.f32 %v267_v28, %v242_v27 }
 0x2a5   :  { %273 = vrot.lane.b32.xlu2 %v2540_v29, %s2362_s19 }
 0x2aa   :  { %v269_v30 = vpop.f32.mrf.mxu2 }
 0x2ab   :  { %v2544_v31 = vadd.f32 %v269_v30, %v242_v27 }
 0x2ad   :  { %301 = vrot.lane.b32.xlu1 %v2544_v31, %s2362_s19 }
 0x2b5   :  { %401 = vrot.lane.b32.xlu1 %v2540_v29, %s2363_s20 }
 0x2ff   :  { %v274_v32 = vpop.permute.xlu2 %273 }
 0x300   :  { %1996 = vmatpush.xpose.msk.msrb.mxu2 %vm275_vm0, %v274_v32 }
 0x303   :  { %1997 = vmatmul.msk.f32.vlgmr.msrb.gmra.mxu2 %vm275_vm0, %v2540_v29 }
 0x31f   :  { %v302_v33 = vpop.permute.xlu1 %301 }
 0x320   :  { %1998 = vmatpush.xpose.msk.msra.mxu3 %vm275_vm0, %v302_v33 }
 0x323   :  { %1999 = vmatmul.msk.f32.vlgmr.msra.gmra.mxu3 %vm275_vm0, %v2544_v31 }
 0x327   :  { %v402_v61 = vpop.permute.xlu1 %401 }
 0x386   :  { %v297_v39 = vpop.f32.mrf.mxu2 }
 0x387   :  { %v298_v40 = vadd.f32 %v297_v39, %v2559_v38 }
 0x389   :  { %v327_v41 = vsel %vm275_vm0, %v298_v40, -inf }
 0x38a   :  { %328 = vmax.xlane.f32.xlu2 %v327_v41 }
 0x3a2   :  { %403 = vrot.lane.b32.xlu2 %v2540_v29, %s2364_s23 }
 0x3a6   :  { %v324_v53 = vpop.f32.mrf.mxu3 }
 0x3a7   :  { %v325_v54 = vadd.f32 %v324_v53, %v2571_v52 }
 0x3a9   :  { %v330_v55 = vsel %vm275_vm0, %v325_v54, -inf }
 0x3fd   :  { %v329_v42 = vpop.xlane.xlu2 %328 }
 0x3fe   :  { %v333_v43 = vsub.f32 %v298_v40, %v329_v42 }
 0x400   :  { %v335_v44 = vmul.f32 1.442695, %v333_v43 }
 0x402   :  { %2266 = vpow2.f32 %v335_v44 }
 0x405   :  { %v404_v60 = vpop.permute.xlu2 %403 }
 0x408   :  { %v2267_v45 = vpop.eup %2266 }
 0x409   :  { %v339_v46 = vsel %vm275_vm0, %v2267_v45, 0.0 }
 0x40a   :  { %340 = vadd.xlane.f32.xlu0 %v339_v46 }
 0x41e   :  { %349 = vrot.lane.b32.xlu0 %v2540_v29, %s2365_s24 }
 0x448   :  { %331 = vmax.xlane.f32.xlu0 %v330_v55 }
 0x45c   :  { %431 = vrot.lane.b32.xlu0 %v2544_v31, %s2364_s23 }
 0x464   :  { %429 = vrot.lane.b32.xlu0 %v2544_v31, %s2363_s20 }
 0x46c   :  { %561 = vrot.lane.b32.xlu0 %v2544_v31, %s2366_s5 }
 0x474   :  { %663 = vrot.lane.b32.xlu0 %v2540_v29, %s2367_s2 }
 0x47d   :  { %v341_v56 = vpop.xlane.xlu0 %340 }
 0x47e   :  { %2268 = vrcp.f32 %v341_v56 }
 0x484   :  { %v2269_v57 = vpop.eup %2268 }
 0x485   :  { %v347_v59 = vmul.f32 %v2269_v57, %v2267_v45 }
 0x490   :  { %v350_v58 = vpop.permute.xlu0 %349 }
 0x491   :  { %370 = vmatpush.msra.mxu0 %v350_v58 }
 0x492   :  { %2000 = vmatmul.msk.f32.vlgmr.msra.gmra.mxu0 %vm275_vm0, %v347_v59 }
 0x493   :  { %2002 = vmatpush.xpose.msk.msrb.mxu0 %vm275_vm0, %v404_v60 }
 0x49a   :  { %2003 = vmatmul.msk.f32.vlgmr.msrb.gmra.mxu0 %vm275_vm0, %v402_v61 }
 0x4bb   :  { %v332_v62 = vpop.xlane.xlu0 %331 }
 0x4bc   :  { %v334_v63 = vsub.f32 %v325_v54, %v332_v62 }
 0x4be   :  { %v337_v0 = vmul.f32 1.442695, %v334_v63 }
 0x4c0   :  { %2270 = vpow2.f32 %v337_v0 }
 0x4c6   :  { %v2271_v1 = vpop.eup %2270 }
 0x4c7   :  { %v342_v2 = vsel %vm275_vm0, %v2271_v1, 0.0 }
 0x4c8   :  { %343 = vadd.xlane.f32.xlu2 %v342_v2 }
 0x4ce   :  { %v432_v3 = vpop.permute.xlu0 %431 }
 0x4cf   :  { %2004 = vmatpush.xpose.msk.msra.mxu0 %vm275_vm0, %v432_v3 }
 0x4d6   :  { %v430_v4 = vpop.permute.xlu0 %429 }
 0x4d7   :  { %2005 = vmatmul.msk.f32.vlgmr.msra.gmra.mxu0 %vm275_vm0, %v430_v4 }
 0x4de   :  { %v562_v5 = vpop.permute.xlu0 %561 }
 0x4e0   :  { %479 = vrot.lane.b32.xlu2 %v2540_v29, %s2368_s27 }
 0x4e6   :  { %v664_v6 = vpop.permute.xlu0 %663 }
 0x4e7   :  { %2014 = vmatpush.xpose.msk.msra.mxu1 %vm275_vm0, %v664_v6 }
 0x4e8   :  { %559 = vrot.lane.b32.xlu2 %v2544_v31, %s2369_s28 }
 0x4f0   :  { %661 = vrot.lane.b32.xlu2 %v2540_v29, %s2370_s3 }
 0x50f   :  { %v2596_v7 = vpop.f32.mrf.mxu0 }
 0x517   :  { %v426_v8 = vpop.f32.mrf.mxu0 }
 0x518   :  { %v427_v9 = vadd.f32 %v426_v8, %v2559_v38 }
 0x51a   :  { %v457_v10 = vsel %vm275_vm0, %v427_v9, -inf }
 0x51b   :  { %458 = vmax.xlane.f32.xlu1 %v457_v10 }
 0x534   :  { %375 = vrot.lane.b32.xlu1 %v2544_v31, %s2365_s24 }
 0x53b   :  { %v344_v11 = vpop.xlane.xlu2 %343 }
 0x53c   :  { %533 = vrot.lane.b32.xlu1 %v2540_v29, %s2366_s5 }
 0x543   :  { %v480_v12 = vpop.permute.xlu2 %479 }
 0x544   :  { %531 = vrot.lane.b32.xlu1 %v2540_v29, %s2369_s28 }
 0x54b   :  { %v560_v13 = vpop.permute.xlu2 %559 }
 0x54c   :  { %691 = vrot.lane.b32.xlu1 %v2544_v31, %s2367_s2 }
 0x553   :  { %v662_v14 = vpop.permute.xlu2 %661 }
 0x554   :  { %2015 = vmatmul.msk.f32.vlgmr.msra.gmra.mxu1 %vm275_vm0, %v662_v14  ;;  %v454_v15 = vpop.f32.mrf.mxu0 }
 0x555   :  { %v455_v16 = vadd.f32 %v454_v15, %v2571_v52 }
 0x557   :  { %v460_v17 = vsel %vm275_vm0, %v455_v16, -inf }
 0x576   :  { %461 = vmax.xlane.f32.xlu1 %v460_v17 }
 0x58e   :  { %v459_v18 = vpop.xlane.xlu1 %458 }
 0x58f   :  { %v463_v19 = vsub.f32 %v427_v9, %v459_v18 }
 0x591   :  { %v465_v20 = vmul.f32 1.442695, %v463_v19 }
 0x593   :  { %2272 = vpow2.f32 %v465_v20 }
 0x594   :  { %2274 = vrcp.f32 %v344_v11 }
 0x599   :  { %v2273_v21 = vpop.eup %2272 }
 0x59a   :  { %v469_v22 = vsel %vm275_vm0, %v2273_v21, 0.0  ;;  %v2275_v25 = vpop.eup %2274 }
 0x59b   :  { %470 = vadd.xlane.f32.xlu0 %v469_v22  ;;  %v348_v28 = vmul.f32 %v2275_v25, %v2271_v1 }
 0x5a6   :  { %v376_v27 = vpop.permute.xlu1 %375 }
 0x5a7   :  { %396 = vmatpush.msrb.mxu3 %v376_v27 }
 0x5a8   :  { %2001 = vmatmul.msk.f32.vlgmr.msrb.gmra.mxu3 %vm275_vm0, %v348_v28 }
 0x5a9   :  { %500 = vmatpush.msra.mxu3 %v480_v12 }
 0x5ab   :  { %2010 = vmatpush.xpose.msk.msrb.mxu3 %vm275_vm0, %v562_v5 }
 0x5ae   :  { %v534_v30 = vpop.permute.xlu1 %533 }
 0x5af   :  { %689 = vrot.lane.b32.xlu0 %v2544_v31, %s2370_s3  ;;  %2008 = vmatpush.xpose.msk.msrb.mxu0 %vm275_vm0, %v534_v30 }
 0x5b6   :  { %v532_v32 = vpop.permute.xlu1 %531 }
 0x5b7   :  { %2009 = vmatmul.msk.f32.vlgmr.msrb.gmra.mxu0 %vm275_vm0, %v532_v32 }
 0x5be   :  { %v692_v40 = vpop.permute.xlu1 %691 }
 0x5d1   :  { %v686_v33 = vpop.f32.mrf.mxu1 }
 0x5d2   :  { %v687_v34 = vadd.f32 %v686_v33, %v2559_v38 }
 0x5d4   :  { %v717_v35 = vsel %vm275_vm0, %v687_v34, -inf }
 0x5d5   :  { %718 = vmax.xlane.f32.xlu1 %v717_v35 }
 0x5e9   :  { %v462_v46 = vpop.xlane.xlu1 %461 }
 0x5ea   :  { %v464_v49 = vsub.f32 %v455_v16, %v462_v46 }
 0x5ec   :  { %v467_v50 = vmul.f32 1.442695, %v464_v49 }
 0x60e   :  { %v471_v36 = vpop.xlane.xlu0 %470 }
 0x60f   :  { %2276 = vrcp.f32 %v471_v36 }
 0x610   :  { %2278 = vpow2.f32 %v467_v50 }
 0x615   :  { %v2277_v37 = vpop.eup %2276 }
 0x616   :  { %v477_v39 = vmul.f32 %v2277_v37, %v2273_v21  ;;  %v2279_v56 = vpop.eup %2278  ;;  %v2205_v21 = vpack.i.bf16 %v2544_v31, %v2540_v29 }
 0x617   :  { %v472_v0 = vsel %vm275_vm0, %v2279_v56, 0.0 }
 0x618   :  { %2006 = vmatmul.msk.f32.vlgmr.msra.gmra.mxu3 %vm275_vm0, %v477_v39 }
 0x619   :  { %2016 = vmatpush.xpose.msk.msra.mxu3 %vm275_vm0, %v692_v40 }
 0x620   :  { %2011 = vmatmul.msk.f32.vlgmr.msrb.gmra.mxu3 %vm275_vm0, %v560_v13 }
 0x621   :  { %v690_v41 = vpop.permute.xlu0 %689 }
 0x628   :  { %2017 = vmatmul.msk.f32.vlgmr.msra.gmra.mxu3 %vm275_vm0, %v690_v41 }
 0x62b   :  { %v2626_v45 = vpop.f32.mrf.mxu3 }
 0x634   :  { %v556_v42 = vpop.f32.mrf.mxu0 }
 0x635   :  { %v557_v43 = vadd.f32 %v556_v42, %v2559_v38 }
 0x637   :  { %v587_v44 = vsel %vm275_vm0, %v557_v43, -inf }
 0x638   :  { %588 = vmax.xlane.f32.xlu2 %v587_v44 }
 0x648   :  { %v719_v55 = vpop.xlane.xlu1 %718 }
 0x649   :  { %v723_v61 = vsub.f32 %v687_v34, %v719_v55  ;;  %v2164_v55 = vld [vmem:[%s2933_s7] sm:$0xff] }
 0x64b   :  { %v725_v1 = vmul.f32 1.442695, %v723_v61 }
 0x69b   :  { %v2628_v48 = vpop.f32.mrf.mxu3 }
 0x6a3   :  { %v584_v51 = vpop.f32.mrf.mxu3 }
 0x6a4   :  { %v585_v53 = vadd.f32 %v584_v51, %v2571_v52 }
 0x6a6   :  { %v590_v54 = vsel %vm275_vm0, %v585_v53, -inf }
 0x6a7   :  { %591 = vmax.xlane.f32.xlu0 %v590_v54  ;;  %v2165_v54 = vld [vmem:[%s2933_s7 + $0x8] sm:$0xff] }
 0x6a8   :  { %850 = vmatpush.bf16.msrb.mxu1 %v2165_v54 }
 0x6ab   :  { %v714_v57 = vpop.f32.mrf.mxu3  ;;  %v589_v58 = vpop.xlane.xlu2 %588 }
 0x6ac   :  { %v715_v59 = vadd.f32 %v714_v57, %v2571_v52  ;;  %v593_v60 = vsub.f32 %v557_v43, %v589_v58  ;;  %851 = vmatpush.bf16.msrb.mxu1 %v2164_v55  ;;  %v907_v55 = vperm.slane %v2537_v26, 3 }
 0x6ae   :  { %v595_v62 = vmul.f32 1.442695, %v593_v60  ;;  %v720_v63 = vsel %vm275_vm0, %v715_v59, -inf }
 0x6af   :  { %721 = vmax.xlane.f32.xlu2 %v720_v63  ;;  %473 = vadd.xlane.f32.xlu0 %v472_v0 }
 0x6b0   :  { %2280 = vpow2.f32 %v595_v62 }
 0x6b1   :  { %2282 = vpow2.f32 %v725_v1 }
 0x6b6   :  { %v2281_v2 = vpop.eup %2280 }
 0x6b7   :  { %v599_v3 = vsel %vm275_vm0, %v2281_v2, 0.0  ;;  %v2283_v4 = vpop.eup %2282 }
 0x6b8   :  { %600 = vadd.xlane.f32.xlu1 %v599_v3  ;;  %v729_v5 = vsel %vm275_vm0, %v2283_v4, 0.0 }
 0x6c0   :  { %730 = vadd.xlane.f32.xlu1 %v729_v5 }
 0x6c7   :  { %505 = vrot.lane.b32.xlu2 %v2544_v31, %s2368_s27 }
 0x6cf   :  { %765 = vrot.lane.b32.xlu2 %v2544_v31, %s2371_s29 }
 0x71a   :  { %v592_v6 = vpop.xlane.xlu0 %591 }
 0x71b   :  { %v594_v8 = vsub.f32 %v585_v53, %v592_v6 }
 0x71d   :  { %v597_v9 = vmul.f32 1.442695, %v594_v8 }
 0x71f   :  { %2284 = vpow2.f32 %v597_v9  ;;  %v828_v9 = vperm.slane %v2537_v26, 1 }
 0x722   :  { %v474_v10 = vpop.xlane.xlu0 %473  ;;  %v722_v11 = vpop.xlane.xlu2 %721 }
 0x723   :  { %2286 = vrcp.f32 %v474_v10  ;;  %v724_v12 = vsub.f32 %v715_v59, %v722_v11 }
 0x725   :  { %v2285_v13 = vpop.eup %2284  ;;  %v727_v14 = vmul.f32 1.442695, %v724_v12 }
 0x726   :  { %v602_v15 = vsel %vm275_vm0, %v2285_v13, 0.0 }
 0x727   :  { %2288 = vpow2.f32 %v727_v14  ;;  %603 = vadd.xlane.f32.xlu0 %v602_v15 }
 0x729   :  { %v2287_v16 = vpop.eup %2286 }
 0x72a   :  { %v478_v17 = vmul.f32 %v2287_v16, %v2279_v56  ;;  %v506_v18 = vpop.permute.xlu2 %505 }
 0x72b   :  { %526 = vmatpush.msra.mxu2 %v506_v18  ;;  %v601_v22 = vpop.xlane.xlu1 %600 }
 0x72c   :  { %2007 = vmatmul.msk.f32.vlgmr.msra.gmra.mxu2 %vm275_vm0, %v478_v17  ;;  %2290 = vrcp.f32 %v601_v22 }
 0x72d   :  { %v2289_v19 = vpop.eup %2288 }
 0x72e   :  { %v732_v20 = vsel %vm275_vm0, %v2289_v19, 0.0 }
 0x72f   :  { %733 = vadd.xlane.f32.xlu1 %v732_v20 }
 0x732   :  { %v2291_v28 = vpop.eup %2290 }
 0x733   :  { %v731_v25 = vpop.xlane.xlu1 %730  ;;  %v607_v36 = vmul.f32 %v2291_v28, %v2281_v2 }
 0x73b   :  { %2206 = vrot.lane.b32.xlu0 %v2205_v21, %s2372_s4 }
 0x748   :  { %739 = vrot.lane.b32.xlu1 %v2540_v29, %s2371_s29  ;;  %v766_v29 = vpop.permute.xlu2 %765 }
 0x79a   :  { %v604_v27 = vpop.xlane.xlu0 %603 }
 0x79b   :  { %2292 = vrcp.f32 %v604_v27 }
 0x7a1   :  { %v2293_v32 = vpop.eup %2292 }
 0x7a2   :  { %v734_v30 = vpop.xlane.xlu1 %733  ;;  %v608_v31 = vmul.f32 %v2293_v32, %v2285_v13 }
 0x7a3   :  { %2294 = vrcp.f32 %v734_v30 }
 0x7a4   :  { %2296 = vrcp.f32 %v731_v25 }
 0x7a9   :  { %v2295_v40 = vpop.eup %2294 }
 0x7aa   :  { %v2297_v41 = vpop.eup %2296  ;;  %v738_v42 = vmul.f32 %v2295_v40, %v2289_v19 }
 0x7ab   :  { %v737_v43 = vmul.f32 %v2297_v41, %v2283_v4 }
 0x7ad   :  { %v2207_v33 = vpop.permute.xlu0 %2206 }
 0x7ae   :  { %v2209_v34 = vunpack.i.h.bf16 %v2207_v33  ;;  %v2208_v35 = vunpack.i.l.bf16 %v2207_v33  ;;  %v2166_v33 = vld [vmem:[%s2934_s8] sm:$0xff] }
 0x7af   :  { %v528_v37 = vpop.f32.mrf.mxu2 }
 0x7b0   :  { %v2210_v39 = vpack.i.bf16 %v528_v37, %v2628_v48  ;;  %630 = vmatpush.msrb.mxu2 %v2208_v35  ;;  %656 = vmatpush.msra.mxu0 %v2209_v34 }
 0x7b1   :  { %2012 = vmatmul.msk.f32.vlgmr.msrb.gmra.mxu2 %vm275_vm0, %v607_v36  ;;  %2013 = vmatmul.msk.f32.vlgmr.msra.gmra.mxu0 %vm275_vm0, %v608_v31 }
 0x7b2   :  { %786 = vmatpush.msrb.mxu0 %v766_v29  ;;  %2211 = vrot.lane.b32.xlu0 %v2210_v39, %s2373_s30 }
 0x7b9   :  { %2019 = vmatmul.msk.f32.vlgmr.msrb.gmra.mxu0 %vm275_vm0, %v738_v42 }
 0x7ba   :  { %v740_v44 = vpop.permute.xlu1 %739 }
 0x7bb   :  { %760 = vmatpush.msra.mxu2 %v740_v44 }
 0x7bc   :  { %2018 = vmatmul.msk.f32.vlgmr.msra.gmra.mxu2 %vm275_vm0, %v737_v43 }
 0x824   :  { %v2212_v56 = vpop.permute.xlu0 %2211 }
 0x825   :  { %v2214_v58 = vunpack.i.h.bf16 %v2212_v56  ;;  %v2213_v59 = vunpack.i.l.bf16 %v2212_v56 }
 0x827   :  { %v816_v63 = vsel %vm275_vm0, %v2626_v45, %v2214_v58  ;;  %v815_v0 = vsel %vm275_vm0, %v2596_v7, %v2213_v59 }
 0x82e   :  { %v658_v46 = vpop.f32.mrf.mxu0 }
 0x834   :  { %v632_v48 = vpop.f32.mrf.mxu2 }
 0x835   :  { %v2215_v49 = vpack.i.bf16 %v658_v46, %v632_v48 }
 0x836   :  { %v788_v50 = vpop.f32.mrf.mxu0 }
 0x837   :  { %2216 = vrot.lane.b32.xlu2 %v2215_v49, %s2374_s15 }
 0x83f   :  { %v762_v51 = vpop.f32.mrf.mxu2 }
 0x840   :  { %v2220_v53 = vpack.i.bf16 %v788_v50, %v762_v51  ;;  %v904_v50 = vperm.slane %v2537_v26, 2 }
 0x842   :  { %2221 = vrot.lane.b32.xlu0 %v2220_v53, %s2375_s16 }
 0x891   :  { %v2217_v57 = vpop.permute.xlu2 %2216 }
 0x892   :  { %v2219_v60 = vunpack.i.h.bf16 %v2217_v57  ;;  %v2218_v61 = vunpack.i.l.bf16 %v2217_v57 }
 0x894   :  { %v819_v3 = vsel %vm817_vm1, %v816_v63, %v2219_v60  ;;  %v818_v4 = vsel %vm817_vm1, %v815_v0, %v2218_v61  ;;  %v2170_v63 = vld [vmem:[%s2935_s9 + $0x10] sm:$0xff]  ;;  %v2169_v0 = vld [vmem:[%s2935_s9 + $0x8] sm:$0xff] }
 0x8b4   :  { %v2222_v62 = vpop.permute.xlu0 %2221 }
 0x8b5   :  { %v2224_v1 = vunpack.i.h.bf16 %v2222_v62  ;;  %v2223_v2 = vunpack.i.l.bf16 %v2222_v62  ;;  %v2171_v62 = vld [vmem:[%s2935_s9 + $0x18] sm:$0xff] }
 0x8b6   :  { %1005 = vmatpush.bf16.msrb.mxu2 %v2171_v62 }
 0x8b7   :  { %v821_v5 = vsel %vm820_vm2, %v818_v4, %v2223_v2  ;;  %v822_v6 = vsel %vm820_vm2, %v819_v3, %v2224_v1  ;;  %v2168_v1 = vld [vmem:[%s2935_s9] sm:$0xff]  ;;  %v915_v2 = vperm.slane %v2537_v26, 4 }
 0x8b8   :  { %v827_v8 = vpack.c.bf16 %v822_v6, %v821_v5 }
 0x8ba   :  { %2028 = vmatmul.msk.bf16.vlgmr.msrb.gmra.mxu1 %vm164_vm8, %v827_v8  ;;  %1006 = vmatpush.bf16.msrb.mxu2 %v2170_v63 }
 0x8be   :  { %1007 = vmatpush.bf16.msrb.mxu2 %v2169_v0 }
 0x8c2   :  { %1008 = vmatpush.bf16.msrb.mxu2 %v2168_v1 }
 0x937   :  { %v853_v10 = vpop.f32.mrf.mxu1 }
 0x938   :  { %v854_v45 = vadd.f32 %v853_v10, %v828_v9 }
 0x93a   :  { %v858_v11 = vadd.f32 %v854_v45, %v2527_v23 }
 0x93c   :  { %v860_v7 = vsel %vm164_vm8, %v858_v11, 0.0 }
 0x93d   :  { %861 = vadd.xlane.f32.xlu2 %v860_v7 }
 0x93f   :  { %v855_v12 = vpop.f32.mrf.mxu1 }
 0x940   :  { %v856_v13 = vadd.f32 %v855_v12, %v828_v9 }
 0x942   :  { %v859_v14 = vadd.f32 %v856_v13, %v2529_v24  ;;  %v2167_v24 = vld [vmem:[%s2934_s8 + $0x8] sm:$0xff] }
 0x943   :  { %937 = vmatpush.bf16.msrb.mxu3 %v2167_v24 }
 0x944   :  { %v863_v15 = vsel %vm164_vm8, %v859_v14, 0.0 }
 0x945   :  { %864 = vadd.xlane.f32.xlu1 %v863_v15 }
 0x947   :  { %938 = vmatpush.bf16.msrb.mxu3 %v2166_v33 }
 0x9b0   :  { %v862_v16 = vpop.xlane.xlu2 %861 }
 0x9b1   :  { %v866_v17 = vmul.f32 %v862_v16, %v2510_v47 }
 0x9b3   :  { %v868_v18 = vsub.f32 %v858_v11, %v866_v17 }
 0x9b5   :  { %v870_v19 = vmul.f32 %v868_v18, %v868_v18 }
 0x9b7   :  { %v872_v20 = vsel %vm164_vm8, %v870_v19, 0.0 }
 0x9b8   :  { %v865_v21 = vpop.xlane.xlu1 %864  ;;  %873 = vadd.xlane.f32.xlu0 %v872_v20 }
 0x9b9   :  { %v867_v23 = vmul.f32 %v865_v21, %v2510_v47 }
 0x9bb   :  { %v869_v22 = vsub.f32 %v859_v14, %v867_v23 }
 0x9bd   :  { %v871_v25 = vmul.f32 %v869_v22, %v869_v22 }
 0x9bf   :  { %v875_v27 = vsel %vm164_vm8, %v871_v25, 0.0 }
 0x9c0   :  { %876 = vadd.xlane.f32.xlu2 %v875_v27  ;;  %v972_v27 = vperm.slane %v2537_v26, 5 }
 0xa2b   :  { %v874_v28 = vpop.xlane.xlu0 %873 }
 0xa2c   :  { %v878_v30 = vmul.f32 %v874_v28, %v2510_v47 }
 0xa2e   :  { %v880_v32 = vadd.f32 1e-12, %v878_v30 }
 0xa30   :  { %2298 = vrsqrt.f32 %v880_v32  ;;  %vm888_vm4 = vweird.f32 %v880_v32 }
 0xa33   :  { %v877_v34 = vpop.xlane.xlu2 %876 }
 0xa34   :  { %v879_v35 = vmul.f32 %v877_v34, %v2510_v47 }
 0xa36   :  { %v2299_v36 = vpop.eup %2298  ;;  %v881_v31 = vadd.f32 1e-12, %v879_v35 }
 0xa37   :  { %v883_v37 = vmul.f32 %v2299_v36, %v880_v32  ;;  %vm889_vm3 = vweird.f32 %v2299_v36 }
 0xa38   :  { %2300 = vrsqrt.f32 %v881_v31  ;;  %vm890_vm5 = vmor %vm888_vm4, %vm889_vm3  ;;  %vm898_vm7 = vweird.f32 %v881_v31 }
 0xa39   :  { %v884_v39 = vmul.f32 %v2299_v36, %v883_v37 }
 0xa3b   :  { %v885_v29 = vmul.f32 0.5, %v884_v39 }
 0xa3d   :  { %v886_v40 = vsub.f32 1.5, %v885_v29 }
 0xa3e   :  { %v2301_v41 = vpop.eup %2300 }
 0xa3f   :  { %v887_v42 = vmul.f32 %v2299_v36, %v886_v40  ;;  %v893_v43 = vmul.f32 %v2301_v41, %v881_v31  ;;  %vm899_vm6 = vweird.f32 %v2301_v41 }
 0xa40   :  { %vm900_vm9 = vmor %vm898_vm7, %vm899_vm6 }
 0xa41   :  { %v894_v44 = vmul.f32 %v2301_v41, %v893_v43  ;;  %v891_v46 = vsel %vm890_vm5, %v2299_v36, %v887_v42 }
 0xa42   :  { %v902_v51 = vmul.f32 %v891_v46, %v868_v18 }
 0xa43   :  { %v895_v48 = vmul.f32 0.5, %v894_v44 }
 0xa44   :  { %v905_v56 = vmul.f32 %v904_v50, %v902_v51 }
 0xa45   :  { %v896_v49 = vsub.f32 1.5, %v895_v48  ;;  %v2173_v48 = vld [vmem:[%s2929_s6 + $0x18] sm:$0xff] }
 0xa46   :  { %v908_v59 = vadd.f32 %v907_v55, %v905_v56  ;;  %1097 = vmatpush.bf16.msra.mxu0 %v2173_v48 }
 0xa47   :  { %v897_v53 = vmul.f32 %v2301_v41, %v896_v49 }
 0xa49   :  { %v901_v54 = vsel %vm900_vm9, %v2301_v41, %v897_v53  ;;  %v2172_v53 = vld [vmem:[%s2929_s6 + $0x10] sm:$0xff] }
 0xa4a   :  { %v903_v57 = vmul.f32 %v901_v54, %v869_v22  ;;  %1098 = vmatpush.bf16.msra.mxu0 %v2172_v53 }
 0xa4c   :  { %v906_v58 = vmul.f32 %v904_v50, %v903_v57 }
 0xa4e   :  { %v909_v60 = vadd.f32 %v907_v55, %v906_v58 }
 0xa50   :  { %v914_v61 = vpack.c.bf16 %v909_v60, %v908_v59 }
 0xa52   :  { %2037 = vmatmul.msk.bf16.vlgmr.msrb.gmra.mxu3 %vm164_vm8, %v914_v61 }
 0xad5   :  { %v940_v3 = vpop.f32.mrf.mxu3 }
 0xad6   :  { %v941_v4 = vadd.f32 %v940_v3, %v915_v2 }
 0xad8   :  { %v947_v5 = vmul.f32 0.044715, %v941_v4  ;;  %v945_v19 = vmul.f32 0.5, %v941_v4 }
 0xada   :  { %v949_v6 = vmul.f32 %v947_v5, %v941_v4  ;;  %v1061_v5 = vperm.slane %v2537_v26, 6 }
 0xadc   :  { %v951_v8 = vmul.f32 %v949_v6, %v941_v4 }
 0xadd   :  { %v942_v9 = vpop.f32.mrf.mxu3 }
 0xade   :  { %v953_v10 = vadd.f32 %v951_v8, %v941_v4  ;;  %v943_v45 = vadd.f32 %v942_v9, %v915_v2 }
 0xae0   :  { %v948_v11 = vmul.f32 0.044715, %v943_v45  ;;  %v955_v7 = vmul.f32 0.7978846, %v953_v10  ;;  %v946_v20 = vmul.f32 0.5, %v943_v45  ;;  %v1064_v10 = vperm.slane %v2537_v26, 7 }
 0xae2   :  { %v950_v12 = vmul.f32 %v948_v11, %v943_v45  ;;  %2302 = vtanh.f32 %v955_v7 }
 0xae4   :  { %v952_v13 = vmul.f32 %v950_v12, %v943_v45 }
 0xae6   :  { %v954_v14 = vadd.f32 %v952_v13, %v943_v45 }
 0xae8   :  { %v956_v15 = vmul.f32 0.7978846, %v954_v14  ;;  %v2303_v16 = vpop.eup %2302 }
 0xae9   :  { %v959_v17 = vadd.f32 1.0, %v2303_v16 }
 0xaea   :  { %2304 = vtanh.f32 %v956_v15  ;;  %v2733_v15 = vld [vmem:[%s2931_s10 + $0x8] sm:$0xff] }
 0xaeb   :  { %v961_v23 = vmul.f32 %v959_v17, %v945_v19  ;;  %v1075_v16 = vperm.slane %v2733_v15, 0 }
 0xaf0   :  { %v2305_v18 = vpop.eup %2304 }
 0xaf1   :  { %v960_v21 = vadd.f32 1.0, %v2305_v18 }
 0xaf3   :  { %v962_v22 = vmul.f32 %v960_v21, %v946_v20 }
 0xaf5   :  { %v971_v25 = vpack.c.bf16 %v962_v22, %v961_v23 }
 0xaf7   :  { %2054 = vmatmul.msk.bf16.vlgmr.msrb.gmra.mxu2 %vm997_vm10, %v971_v25 }
 0xb7a   :  { %v1010_v24 = vpop.f32.mrf.mxu2 }
 0xb7b   :  { %v1011_v28 = vadd.f32 %v1010_v24, %v972_v27 }
 0xb7d   :  { %v1015_v30 = vadd.f32 %v1011_v28, %v908_v59 }
 0xb7f   :  { %v1017_v32 = vsel %vm164_vm8, %v1015_v30, 0.0 }
 0xb80   :  { %1018 = vadd.xlane.f32.xlu1 %v1017_v32 }
 0xb82   :  { %v1012_v33 = vpop.f32.mrf.mxu2 }
 0xb83   :  { %v1013_v34 = vadd.f32 %v1012_v33, %v972_v27 }
 0xb85   :  { %v1016_v35 = vadd.f32 %v1013_v34, %v909_v60 }
 0xb87   :  { %v1020_v36 = vsel %vm164_vm8, %v1016_v35, 0.0 }
 0xb88   :  { %1021 = vadd.xlane.f32.xlu0 %v1020_v36 }
 0xbf3   :  { %v1019_v31 = vpop.xlane.xlu1 %1018 }
 0xbf4   :  { %v1023_v37 = vmul.f32 %v1019_v31, %v2510_v47 }
 0xbf6   :  { %v1025_v39 = vsub.f32 %v1015_v30, %v1023_v37 }
 0xbf8   :  { %v1027_v29 = vmul.f32 %v1025_v39, %v1025_v39 }
 0xbfa   :  { %v1029_v40 = vsel %vm164_vm8, %v1027_v29, 0.0 }
 0xbfb   :  { %v1022_v41 = vpop.xlane.xlu0 %1021  ;;  %1030 = vadd.xlane.f32.xlu2 %v1029_v40 }
 0xbfc   :  { %v1024_v42 = vmul.f32 %v1022_v41, %v2510_v47 }
 0xbfe   :  { %v1026_v43 = vsub.f32 %v1016_v35, %v1024_v42 }
 0xc00   :  { %v1028_v44 = vmul.f32 %v1026_v43, %v1026_v43 }
 0xc02   :  { %v1032_v46 = vsel %vm164_vm8, %v1028_v44, 0.0 }
 0xc03   :  { %1033 = vadd.xlane.f32.xlu1 %v1032_v46 }
 0xc6e   :  { %v1031_v49 = vpop.xlane.xlu2 %1030 }
 0xc6f   :  { %v1035_v50 = vmul.f32 %v1031_v49, %v2510_v47 }
 0xc71   :  { %v1037_v51 = vadd.f32 1e-12, %v1035_v50 }
 0xc73   :  { %2306 = vrsqrt.f32 %v1037_v51  ;;  %vm1045_vm12 = vweird.f32 %v1037_v51 }
 0xc76   :  { %v1034_v54 = vpop.xlane.xlu1 %1033 }
 0xc77   :  { %v1036_v55 = vmul.f32 %v1034_v54, %v2510_v47 }
 0xc79   :  { %v2307_v56 = vpop.eup %2306  ;;  %v1038_v57 = vadd.f32 1e-12, %v1036_v55 }
 0xc7a   :  { %v1040_v58 = vmul.f32 %v2307_v56, %v1037_v51  ;;  %vm1046_vm11 = vweird.f32 %v2307_v56 }
 0xc7b   :  { %2308 = vrsqrt.f32 %v1038_v57  ;;  %vm1047_vm13 = vmor %vm1045_vm12, %vm1046_vm11  ;;  %vm1055_vm15 = vweird.f32 %v1038_v57 }
 0xc7c   :  { %v1041_v59 = vmul.f32 %v2307_v56, %v1040_v58 }
 0xc7e   :  { %v1042_v60 = vmul.f32 0.5, %v1041_v59 }
 0xc80   :  { %v1043_v61 = vsub.f32 1.5, %v1042_v60 }
 0xc81   :  { %v2309_v62 = vpop.eup %2308 }
 0xc82   :  { %v1044_v63 = vmul.f32 %v2307_v56, %v1043_v61  ;;  %v1050_v0 = vmul.f32 %v2309_v62, %v1038_v57  ;;  %vm1056_vm14 = vweird.f32 %v2309_v62 }
 0xc83   :  { %vm1057_vm3 = vmor %vm1055_vm15, %vm1056_vm14 }
 0xc84   :  { %v1051_v1 = vmul.f32 %v2309_v62, %v1050_v0  ;;  %v1048_v2 = vsel %vm1047_vm13, %v2307_v56, %v1044_v63 }
 0xc85   :  { %v1059_v6 = vmul.f32 %v1048_v2, %v1025_v39 }
 0xc86   :  { %v1052_v3 = vmul.f32 0.5, %v1051_v1 }
 0xc87   :  { %v1062_v45 = vmul.f32 %v1061_v5, %v1059_v6 }
 0xc88   :  { %v1053_v4 = vsub.f32 1.5, %v1052_v3 }
 0xc89   :  { %v2723_v12 = vadd.f32 %v1064_v10, %v1062_v45 }
 0xc8a   :  { %v1054_v8 = vmul.f32 %v2309_v62, %v1053_v4 }
 0xc8c   :  { %v1058_v9 = vsel %vm1057_vm3, %v2309_v62, %v1054_v8 }
 0xc8d   :  { %v1060_v11 = vmul.f32 %v1058_v9, %v1026_v43 }
 0xc8f   :  { %v1063_v7 = vmul.f32 %v1061_v5, %v1060_v11 }
 0xc91   :  { %v2725_v13 = vadd.f32 %v1064_v10, %v1063_v7 }
 0xc93   :  { %v1074_v14 = vpack.c.bf16 %v2725_v13, %v2723_v12 }
 0xc95   :  { %2068 = vmatmul.msk.bf16.vlgmr.msra.gmra.mxu0 %vm164_vm8, %v1074_v14 }
 0xd12   :  { %v1100_v26 = vpop.f32.mrf.mxu0 }
 0xd13   :  { %v2736_v17 = vadd.f32 %v1100_v26, %v1075_v16 }
 0xd15   :  { %1235 = vrot.lane.b32.xlu1 %v2736_v17, %s2364_s23  ;;  %1106 = vrot.lane.b32.xlu2 %v2736_v17, %s2362_s19 }
 0xd1a   :  { %v1102_v18 = vpop.f32.mrf.mxu0 }
 0xd1b   :  { %v2742_v19 = vadd.f32 %v1102_v18, %v1075_v16 }
 0xd1d   :  { %1133 = vrot.lane.b32.xlu0 %v2742_v19, %s2362_s19  ;;  %1365 = vrot.lane.b32.xlu1 %v2736_v17, %s2366_s5  ;;  %v2230_v63 = vpack.i.bf16 %v2742_v19, %v2736_v17 }
 0xd1e   :  { %1233 = vrot.lane.b32.xlu2 %v2736_v17, %s2363_s20 }
 0xd25   :  { %1263 = vrot.lane.b32.xlu0 %v2742_v19, %s2364_s23  ;;  %1391 = vrot.lane.b32.xlu1 %v2742_v19, %s2369_s28 }
 0xd26   :  { %1393 = vrot.lane.b32.xlu2 %v2742_v19, %s2366_s5 }
 0xd2d   :  { %1261 = vrot.lane.b32.xlu0 %v2742_v19, %s2363_s20  ;;  %1493 = vrot.lane.b32.xlu1 %v2736_v17, %s2370_s3 }
 0xd2e   :  { %1495 = vrot.lane.b32.xlu2 %v2736_v17, %s2367_s2 }
 0xd35   :  { %1363 = vrot.lane.b32.xlu0 %v2736_v17, %s2369_s28 }
 0xd36   :  { %1521 = vrot.lane.b32.xlu2 %v2742_v19, %s2370_s3 }
 0xd3d   :  { %1523 = vrot.lane.b32.xlu0 %v2742_v19, %s2367_s2 }
 0xd6f   :  { %v1107_v20 = vpop.permute.xlu2 %1106 }
 0xd70   :  { %2069 = vmatpush.xpose.msk.msra.mxu1 %vm275_vm0, %v1107_v20 }
 0xd73   :  { %2070 = vmatmul.msk.f32.vlgmr.msra.gmra.mxu1 %vm275_vm0, %v2736_v17 }
 0xd78   :  { %v1234_v21 = vpop.permute.xlu2 %1233 }
 0xd80   :  { %v1394_v25 = vpop.permute.xlu2 %1393 }
 0xd87   :  { %v1236_v23 = vpop.permute.xlu1 %1235 }
 0xd88   :  { %v1496_v28 = vpop.permute.xlu2 %1495 }
 0xd8f   :  { %v1134_v22 = vpop.permute.xlu0 %1133  ;;  %v1366_v27 = vpop.permute.xlu1 %1365 }
 0xd90   :  { %2071 = vmatpush.xpose.msk.msra.mxu3 %vm275_vm0, %v1134_v22  ;;  %v1522_v36 = vpop.permute.xlu2 %1521 }
 0xd93   :  { %2072 = vmatmul.msk.f32.vlgmr.msra.gmra.mxu3 %vm275_vm0, %v2742_v19 }
 0xd94   :  { %2075 = vmatpush.xpose.msk.msrb.mxu3 %vm275_vm0, %v1236_v23 }
 0xd97   :  { %v1264_v24 = vpop.permute.xlu0 %1263  ;;  %v1392_v32 = vpop.permute.xlu1 %1391 }
 0xd98   :  { %2081 = vmatpush.xpose.msk.msra.mxu3 %vm275_vm0, %v1366_v27  ;;  %2077 = vmatpush.xpose.msk.msra.mxu2 %vm275_vm0, %v1264_v24 }
 0xd9b   :  { %2076 = vmatmul.msk.f32.vlgmr.msrb.gmra.mxu3 %vm275_vm0, %v1234_v21 }
 0xd9c   :  { %2083 = vmatpush.xpose.msk.msrb.mxu2 %vm275_vm0, %v1394_v25  ;;  %2087 = vmatpush.xpose.msk.msrb.mxu3 %vm275_vm0, %v1496_v28 }
 0xd9f   :  { %v1262_v30 = vpop.permute.xlu0 %1261  ;;  %v1494_v34 = vpop.permute.xlu1 %1493 }
 0xda0   :  { %2078 = vmatmul.msk.f32.vlgmr.msra.gmra.mxu2 %vm275_vm0, %v1262_v30 }
 0xda7   :  { %v1364_v33 = vpop.permute.xlu0 %1363 }
 0xda8   :  { %2082 = vmatmul.msk.f32.vlgmr.msra.gmra.mxu3 %vm275_vm0, %v1364_v33  ;;  %2084 = vmatmul.msk.f32.vlgmr.msrb.gmra.mxu2 %vm275_vm0, %v1392_v32 }
 0xdaf   :  { %v1524_v35 = vpop.permute.xlu0 %1523 }
 0xdb0   :  { %2088 = vmatmul.msk.f32.vlgmr.msrb.gmra.mxu3 %vm275_vm0, %v1494_v34  ;;  %2089 = vmatpush.xpose.msk.msra.mxu2 %vm275_vm0, %v1524_v35 }
 0xdb3   :  { %2090 = vmatmul.msk.f32.vlgmr.msra.gmra.mxu2 %vm275_vm0, %v1522_v36 }
 0xdf0   :  { %v1129_v31 = vpop.f32.mrf.mxu1 }
 0xdf1   :  { %v1130_v37 = vadd.f32 %v1129_v31, %v2559_v38 }
 0xdf3   :  { %v1159_v39 = vsel %vm275_vm0, %v1130_v37, -inf }
 0xdf4   :  { %1160 = vmax.xlane.f32.xlu0 %v1159_v39 }
 0xe16   :  { %v1156_v29 = vpop.f32.mrf.mxu3 }
 0xe17   :  { %v1157_v40 = vadd.f32 %v1156_v29, %v2571_v52 }
 0xe19   :  { %v1162_v41 = vsel %vm275_vm0, %v1157_v40, -inf }
 0xe1a   :  { %1163 = vmax.xlane.f32.xlu1 %v1162_v41 }
 0xe1e   :  { %v1258_v42 = vpop.f32.mrf.mxu3 }
 0xe1f   :  { %v1259_v43 = vadd.f32 %v1258_v42, %v2559_v38 }
 0xe21   :  { %v1289_v44 = vsel %vm275_vm0, %v1259_v43, -inf }
 0xe22   :  { %1290 = vmax.xlane.f32.xlu2 %v1289_v44 }
 0xe23   :  { %v1286_v46 = vpop.f32.mrf.mxu2 }
 0xe24   :  { %v1287_v48 = vadd.f32 %v1286_v46, %v2571_v52 }
 0xe26   :  { %v1292_v49 = vsel %vm275_vm0, %v1287_v48, -inf }
 0xe27   :  { %1293 = vmax.xlane.f32.xlu0 %v1292_v49 }
 0xe2b   :  { %v1388_v50 = vpop.f32.mrf.mxu3  ;;  %v1416_v51 = vpop.f32.mrf.mxu2 }
 0xe2c   :  { %v1389_v53 = vadd.f32 %v1388_v50, %v2559_v38  ;;  %v1417_v54 = vadd.f32 %v1416_v51, %v2571_v52 }
 0xe2e   :  { %v1419_v55 = vsel %vm275_vm0, %v1389_v53, -inf  ;;  %v1422_v56 = vsel %vm275_vm0, %v1417_v54, -inf }
 0xe2f   :  { %1420 = vmax.xlane.f32.xlu2 %v1419_v55  ;;  %1423 = vmax.xlane.f32.xlu1 %v1422_v56 }
 0xe33   :  { %v1518_v57 = vpop.f32.mrf.mxu3 }
 0xe34   :  { %v1519_v58 = vadd.f32 %v1518_v57, %v2559_v38 }
 0xe36   :  { %v1546_v59 = vpop.f32.mrf.mxu2  ;;  %v1549_v60 = vsel %vm275_vm0, %v1519_v58, -inf }
 0xe37   :  { %v1547_v61 = vadd.f32 %v1546_v59, %v2571_v52  ;;  %1550 = vmax.xlane.f32.xlu0 %v1549_v60 }
 0xe39   :  { %v1552_v62 = vsel %vm275_vm0, %v1547_v61, -inf }
 0xe3a   :  { %1553 = vmax.xlane.f32.xlu2 %v1552_v62 }
 0xe52   :  { %2231 = vrot.lane.b32.xlu2 %v2230_v63, %s2368_s27 }
 0xe67   :  { %v1161_v0 = vpop.xlane.xlu0 %1160 }
 0xe68   :  { %v1165_v1 = vsub.f32 %v1130_v37, %v1161_v0 }
 0xe6a   :  { %v1167_v2 = vmul.f32 1.442695, %v1165_v1 }
 0xe6c   :  { %2310 = vpow2.f32 %v1167_v2 }
 0xe72   :  { %v2805_v3 = vpop.eup %2310 }
 0xe73   :  { %v1171_v38 = vsel %vm275_vm0, %v2805_v3, 0.0 }
 0xe74   :  { %1172 = vadd.xlane.f32.xlu1 %v1171_v38 }
 0xe8d   :  { %v1164_v52 = vpop.xlane.xlu1 %1163 }
 0xe8e   :  { %v1166_v4 = vsub.f32 %v1157_v40, %v1164_v52 }
 0xe90   :  { %v1169_v5 = vmul.f32 1.442695, %v1166_v4 }
 0xe92   :  { %2312 = vpow2.f32 %v1169_v5 }
 0xe95   :  { %v1291_v6 = vpop.xlane.xlu2 %1290 }
 0xe96   :  { %v1295_v8 = vsub.f32 %v1259_v43, %v1291_v6 }
 0xe98   :  { %v2313_v9 = vpop.eup %2312  ;;  %v1297_v10 = vmul.f32 1.442695, %v1295_v8 }
 0xe99   :  { %v1174_v45 = vsel %vm275_vm0, %v2313_v9, 0.0 }
 0xe9a   :  { %2314 = vpow2.f32 %v1297_v10  ;;  %v1294_v11 = vpop.xlane.xlu0 %1293  ;;  %1175 = vadd.xlane.f32.xlu0 %v1174_v45 }
 0xe9b   :  { %v1296_v7 = vsub.f32 %v1287_v48, %v1294_v11 }
 0xe9d   :  { %v1299_v14 = vmul.f32 1.442695, %v1296_v7 }
 0xe9f   :  { %2316 = vpow2.f32 %v1299_v14 }
 0xea0   :  { %v2810_v16 = vpop.eup %2314 }
 0xea1   :  { %v1301_v26 = vsel %vm275_vm0, %v2810_v16, 0.0 }
 0xea2   :  { %v1424_v17 = vpop.xlane.xlu1 %1423  ;;  %1302 = vadd.xlane.f32.xlu2 %v1301_v26  ;;  %v1421_v18 = vpop.xlane.xlu2 %1420 }
 0xea3   :  { %v1426_v19 = vsub.f32 %v1417_v54, %v1424_v17  ;;  %v1425_v20 = vsub.f32 %v1389_v53, %v1421_v18 }
 0xea5   :  { %v2317_v21 = vpop.eup %2316  ;;  %v1429_v23 = vmul.f32 1.442695, %v1426_v19  ;;  %v1427_v22 = vmul.f32 1.442695, %v1425_v20 }
 0xea6   :  { %v1304_v25 = vsel %vm275_vm0, %v2317_v21, 0.0 }
 0xea7   :  { %2318 = vpow2.f32 %v1429_v23  ;;  %1305 = vadd.xlane.f32.xlu1 %v1304_v25 }
 0xea8   :  { %2320 = vpow2.f32 %v1427_v22 }
 0xeaa   :  { %v1551_v27 = vpop.xlane.xlu0 %1550 }
 0xeab   :  { %v1555_v24 = vsub.f32 %v1519_v58, %v1551_v27 }
 0xead   :  { %v2815_v28 = vpop.eup %2318  ;;  %v1557_v30 = vmul.f32 1.442695, %v1555_v24  ;;  %v1554_v31 = vpop.xlane.xlu2 %1553  ;;  %v2175_v24 = vld [vmem:[%s2933_s7 + $0x18] sm:$0xff] }
 0xeae   :  { %v2321_v32 = vpop.eup %2320  ;;  %2226 = vrot.lane.b32.xlu0 %v2230_v63, %s2365_s24  ;;  %v1434_v33 = vsel %vm275_vm0, %v2815_v28, 0.0  ;;  %v1556_v37 = vsub.f32 %v1547_v61, %v1554_v31  ;;  %1681 = vmatpush.bf16.msra.mxu3 %v2175_v24 }
 0xeaf   :  { %2322 = vpow2.f32 %v1557_v30  ;;  %1435 = vadd.xlane.f32.xlu1 %v1434_v33  ;;  %v1431_v34 = vsel %vm275_vm0, %v2321_v32, 0.0 }
 0xeb0   :  { %1432 = vadd.xlane.f32.xlu2 %v1431_v34  ;;  %v1559_v39 = vmul.f32 1.442695, %v1556_v37 }
 0xeb2   :  { %2324 = vpow2.f32 %v1559_v39 }
 0xeb5   :  { %v2821_v35 = vpop.eup %2322  ;;  %v2232_v41 = vpop.permute.xlu2 %2231 }
 0xeb6   :  { %v1561_v36 = vsel %vm275_vm0, %v2821_v35, 0.0  ;;  %v2234_v56 = vunpack.i.h.bf16 %v2232_v41  ;;  %v2233_v57 = vunpack.i.l.bf16 %v2232_v41 }
 0xeb7   :  { %1562 = vadd.xlane.f32.xlu1 %v1561_v36 }
 0xeb8   :  { %v2325_v29 = vpop.eup %2324 }
 0xeb9   :  { %v1564_v40 = vsel %vm275_vm0, %v2325_v29, 0.0 }
 0xec8   :  { %2241 = vrot.lane.b32.xlu2 %v2230_v63, %s2371_s29 }
 0xed0   :  { %2236 = vrot.lane.b32.xlu1 %v2230_v63, %s2372_s4 }
 0xed8   :  { %1565 = vadd.xlane.f32.xlu0 %v1564_v40 }
 0xee7   :  { %v1173_v42 = vpop.xlane.xlu1 %1172 }
 0xee8   :  { %2326 = vrcp.f32 %v1173_v42 }
 0xeee   :  { %v2327_v46 = vpop.eup %2326 }
 0xeef   :  { %v1179_v54 = vmul.f32 %v2327_v46, %v2805_v3 }
 0xf0d   :  { %v1176_v43 = vpop.xlane.xlu0 %1175 }
 0xf0e   :  { %2328 = vrcp.f32 %v1176_v43 }
 0xf14   :  { %v2329_v49 = vpop.eup %2328 }
 0xf15   :  { %v1303_v44 = vpop.xlane.xlu2 %1302  ;;  %v1180_v55 = vmul.f32 %v2329_v49, %v2313_v9 }
 0xf16   :  { %2330 = vrcp.f32 %v1303_v44 }
 0xf1a   :  { %v1306_v48 = vpop.xlane.xlu1 %1305 }
 0xf1b   :  { %2332 = vrcp.f32 %v1306_v48  ;;  %v1659_v48 = vperm.slane %v2733_v15, 1 }
 0xf1c   :  { %v2331_v58 = vpop.eup %2330 }
 0xf1d   :  { %v1309_v60 = vmul.f32 %v2331_v58, %v2810_v16 }
 0xf20   :  { %v2227_v50 = vpop.permute.xlu0 %2226 }
 0xf21   :  { %v2229_v51 = vunpack.i.h.bf16 %v2227_v50  ;;  %v2228_v53 = vunpack.i.l.bf16 %v2227_v50  ;;  %v2333_v59 = vpop.eup %2332 }
 0xf22   :  { %v1310_v61 = vmul.f32 %v2333_v59, %v2317_v21  ;;  %v1436_v62 = vpop.xlane.xlu1 %1435 }
 0xf23   :  { %1202 = vmatpush.msrb.mxu0 %v2228_v53  ;;  %1228 = vmatpush.msrb.mxu1 %v2229_v51  ;;  %v1433_v63 = vpop.xlane.xlu2 %1432  ;;  %2334 = vrcp.f32 %v1436_v62 }
 0xf24   :  { %2073 = vmatmul.msk.f32.vlgmr.msrb.gmra.mxu0 %vm275_vm0, %v1179_v54  ;;  %2074 = vmatmul.msk.f32.vlgmr.msrb.gmra.mxu1 %vm275_vm0, %v1180_v55  ;;  %2336 = vrcp.f32 %v1433_v63 }
 0xf25   :  { %1332 = vmatpush.msra.mxu0 %v2233_v57  ;;  %1358 = vmatpush.msra.mxu1 %v2234_v56 }
 0xf29   :  { %v2335_v1 = vpop.eup %2334 }
 0xf2a   :  { %v1563_v0 = vpop.xlane.xlu1 %1562  ;;  %v2337_v2 = vpop.eup %2336  ;;  %v1440_v5 = vmul.f32 %v2335_v1, %v2815_v28  ;;  %v2174_v28 = vld [vmem:[%s2933_s7 + $0x10] sm:$0xff] }
 0xf2b   :  { %v2242_v3 = vpop.permute.xlu2 %2241  ;;  %2338 = vrcp.f32 %v1563_v0  ;;  %v1439_v6 = vmul.f32 %v2337_v2, %v2321_v32  ;;  %1682 = vmatpush.bf16.msra.mxu3 %v2174_v28 }
 0xf2c   :  { %2079 = vmatmul.msk.f32.vlgmr.msra.gmra.mxu0 %vm275_vm0, %v1309_v60  ;;  %2080 = vmatmul.msk.f32.vlgmr.msra.gmra.mxu1 %vm275_vm0, %v1310_v61  ;;  %v2244_v8 = vunpack.i.h.bf16 %v2242_v3  ;;  %v2243_v9 = vunpack.i.l.bf16 %v2242_v3 }
 0xf31   :  { %v2339_v10 = vpop.eup %2338 }
 0xf32   :  { %v1569_v11 = vmul.f32 %v2339_v10, %v2821_v35 }
 0xf42   :  { %v2237_v38 = vpop.permute.xlu1 %2236 }
 0xf43   :  { %v2239_v52 = vunpack.i.h.bf16 %v2237_v38  ;;  %v2238_v4 = vunpack.i.l.bf16 %v2237_v38 }
 0xf45   :  { %1462 = vmatpush.msrb.mxu0 %v2238_v4  ;;  %1488 = vmatpush.msrb.mxu1 %v2239_v52  ;;  %v2176_v4 = vld [vmem:[%s2934_s8 + $0x10] sm:$0xff] }
 0xf46   :  { %2085 = vmatmul.msk.f32.vlgmr.msrb.gmra.mxu0 %vm275_vm0, %v1439_v6  ;;  %2086 = vmatmul.msk.f32.vlgmr.msrb.gmra.mxu1 %vm275_vm0, %v1440_v5 }
 0xf47   :  { %1592 = vmatpush.msra.mxu0 %v2243_v9  ;;  %1618 = vmatpush.msra.mxu1 %v2244_v8 }
 0xf4b   :  { %v1566_v45 = vpop.xlane.xlu0 %1565 }
 0xf4c   :  { %2340 = vrcp.f32 %v1566_v45 }
 0xf4e   :  { %2091 = vmatmul.msk.f32.vlgmr.msra.gmra.mxu0 %vm275_vm0, %v1569_v11 }
 0xf52   :  { %v2341_v7 = vpop.eup %2340 }
 0xf53   :  { %v1570_v14 = vmul.f32 %v2341_v7, %v2325_v29 }
 0xf55   :  { %2092 = vmatmul.msk.f32.vlgmr.msra.gmra.mxu1 %vm275_vm0, %v1570_v14 }
 0xfa1   :  { %v1204_v16 = vpop.f32.mrf.mxu0  ;;  %v1230_v26 = vpop.f32.mrf.mxu1 }
 0xfa9   :  { %v1334_v17 = vpop.f32.mrf.mxu0  ;;  %v1360_v18 = vpop.f32.mrf.mxu1 }
 0xfaa   :  { %v2245_v19 = vpack.i.bf16 %v1360_v18, %v1334_v17 }
 0xfac   :  { %2246 = vrot.lane.b32.xlu2 %v2245_v19, %s2373_s30 }
 0xfc3   :  { %v1464_v20 = vpop.f32.mrf.mxu0  ;;  %v1490_v21 = vpop.f32.mrf.mxu1 }
 0xfc4   :  { %v2250_v23 = vpack.i.bf16 %v1490_v21, %v1464_v20  ;;  %v1735_v21 = vperm.slane %v2733_v15, 2 }
 0xfc6   :  { %2251 = vrot.lane.b32.xlu1 %v2250_v23, %s2374_s15 }
 0xfcb   :  { %v1594_v22 = vpop.f32.mrf.mxu0 }
 0xfd2   :  { %v1620_v25 = vpop.f32.mrf.mxu1 }
 0xfd3   :  { %v2255_v27 = vpack.i.bf16 %v1620_v25, %v1594_v22 }
 0xfd5   :  { %2256 = vrot.lane.b32.xlu2 %v2255_v27, %s2375_s16  ;;  %v1738_v27 = vperm.slane %v2733_v15, 3 }
0x1006   :  { %v2247_v30 = vpop.permute.xlu2 %2246 }
0x1007   :  { %v2249_v32 = vunpack.i.h.bf16 %v2247_v30  ;;  %v2248_v33 = vunpack.i.l.bf16 %v2247_v30 }
0x1009   :  { %v1648_v37 = vsel %vm275_vm0, %v1230_v26, %v2249_v32  ;;  %v1647_v39 = vsel %vm275_vm0, %v1204_v16, %v2248_v33 }
0x102f   :  { %v2257_v34 = vpop.permute.xlu2 %2256 }
0x1030   :  { %v2259_v29 = vunpack.i.h.bf16 %v2257_v34  ;;  %v2258_v40 = vunpack.i.l.bf16 %v2257_v34 }
0x1038   :  { %v2252_v35 = vpop.permute.xlu1 %2251 }
0x1039   :  { %v2254_v36 = vunpack.i.h.bf16 %v2252_v35  ;;  %v2253_v31 = vunpack.i.l.bf16 %v2252_v35  ;;  %v2181_v35 = vld [vmem:[%s2935_s9 + $0x38] sm:$0xff] }
0x103a   :  { %1837 = vmatpush.bf16.msrb.mxu0 %v2181_v35 }
0x103b   :  { %v1650_v41 = vsel %vm817_vm1, %v1648_v37, %v2254_v36  ;;  %v1649_v42 = vsel %vm817_vm1, %v1647_v39, %v2253_v31  ;;  %v2180_v36 = vld [vmem:[%s2935_s9 + $0x30] sm:$0xff]  ;;  %v2179_v31 = vld [vmem:[%s2935_s9 + $0x28] sm:$0xff]  ;;  %v2178_v37 = vld [vmem:[%s2935_s9 + $0x20] sm:$0xff]  ;;  %v1747_v39 = vperm.slane %v2733_v15, 4 }
0x103c   :  { %v1651_v43 = vsel %vm820_vm2, %v1649_v42, %v2258_v40  ;;  %v1652_v44 = vsel %vm820_vm2, %v1650_v41, %v2259_v29 }
0x103d   :  { %v1658_v46 = vpack.c.bf16 %v1652_v44, %v1651_v43 }
0x103e   :  { %1838 = vmatpush.bf16.msrb.mxu0 %v2180_v36 }
0x103f   :  { %2105 = vmatmul.msk.bf16.vlgmr.msra.gmra.mxu3 %vm164_vm8, %v1658_v46 }
0x1042   :  { %1839 = vmatpush.bf16.msrb.mxu0 %v2179_v31 }
0x1046   :  { %1840 = vmatpush.bf16.msrb.mxu0 %v2178_v37 }
0x10c2   :  { %v1684_v49 = vpop.f32.mrf.mxu3 }
0x10c3   :  { %v1685_v50 = vadd.f32 %v1684_v49, %v1659_v48 }
0x10c5   :  { %v1689_v51 = vadd.f32 %v1685_v50, %v2723_v12 }
0x10c7   :  { %v1691_v53 = vsel %vm164_vm8, %v1689_v51, 0.0 }
0x10c8   :  { %1692 = vadd.xlane.f32.xlu1 %v1691_v53 }
0x10ca   :  { %v1686_v54 = vpop.f32.mrf.mxu3 }
0x10cb   :  { %v1687_v55 = vadd.f32 %v1686_v54, %v1659_v48 }
0x10cd   :  { %v1690_v56 = vadd.f32 %v1687_v55, %v2725_v13  ;;  %v2177_v13 = vld [vmem:[%s2934_s8 + $0x18] sm:$0xff] }
0x10ce   :  { %1769 = vmatpush.bf16.msrb.mxu2 %v2177_v13 }
0x10cf   :  { %v1694_v57 = vsel %vm164_vm8, %v1690_v56, 0.0 }
0x10d0   :  { %1695 = vadd.xlane.f32.xlu2 %v1694_v57 }
0x10d2   :  { %1770 = vmatpush.bf16.msrb.mxu2 %v2176_v4 }
0x113b   :  { %v1693_v58 = vpop.xlane.xlu1 %1692 }
0x113c   :  { %v1697_v59 = vmul.f32 %v1693_v58, %v2510_v47 }
0x113e   :  { %v1699_v60 = vsub.f32 %v1689_v51, %v1697_v59 }
0x1140   :  { %v1701_v61 = vmul.f32 %v1699_v60, %v1699_v60 }
0x1142   :  { %v1703_v62 = vsel %vm164_vm8, %v1701_v61, 0.0 }
0x1143   :  { %v1696_v63 = vpop.xlane.xlu2 %1695  ;;  %1704 = vadd.xlane.f32.xlu0 %v1703_v62 }
0x1144   :  { %v1698_v12 = vmul.f32 %v1696_v63, %v2510_v47 }
0x1146   :  { %v1700_v0 = vsub.f32 %v1690_v56, %v1698_v12 }
0x1148   :  { %v1702_v1 = vmul.f32 %v1700_v0, %v1700_v0 }
0x114a   :  { %v1706_v2 = vsel %vm164_vm8, %v1702_v1, 0.0 }
0x114b   :  { %1707 = vadd.xlane.f32.xlu0 %v1706_v2 }
0x11b6   :  { %v1705_v3 = vpop.xlane.xlu0 %1704 }
0x11b7   :  { %v1709_v38 = vmul.f32 %v1705_v3, %v2510_v47 }
0x11b9   :  { %v1711_v52 = vadd.f32 1e-12, %v1709_v38 }
0x11bb   :  { %2342 = vrsqrt.f32 %v1711_v52  ;;  %vm1719_vm1 = vweird.f32 %v1711_v52 }
0x11be   :  { %v1708_v5 = vpop.xlane.xlu0 %1707 }
0x11bf   :  { %v1710_v6 = vmul.f32 %v1708_v5, %v2510_v47 }
0x11c1   :  { %v2343_v8 = vpop.eup %2342  ;;  %v1712_v9 = vadd.f32 1e-12, %v1710_v6 }
0x11c2   :  { %v1714_v10 = vmul.f32 %v2343_v8, %v1711_v52  ;;  %vm1720_vm0 = vweird.f32 %v2343_v8 }
0x11c3   :  { %2344 = vrsqrt.f32 %v1712_v9  ;;  %vm1721_vm2 = vmor %vm1719_vm1, %vm1720_vm0  ;;  %vm1729_vm5 = vweird.f32 %v1712_v9 }
0x11c4   :  { %v1715_v45 = vmul.f32 %v2343_v8, %v1714_v10 }
0x11c6   :  { %v1716_v11 = vmul.f32 0.5, %v1715_v45 }
0x11c8   :  { %v1717_v7 = vsub.f32 1.5, %v1716_v11 }
0x11c9   :  { %v2345_v14 = vpop.eup %2344 }
0x11ca   :  { %v1718_v16 = vmul.f32 %v2343_v8, %v1717_v7  ;;  %v1724_v26 = vmul.f32 %v2345_v14, %v1712_v9  ;;  %vm1730_vm4 = vweird.f32 %v2345_v14 }
0x11cb   :  { %vm1731_vm6 = vmor %vm1729_vm5, %vm1730_vm4 }
0x11cc   :  { %v1725_v17 = vmul.f32 %v2345_v14, %v1724_v26  ;;  %v1722_v18 = vsel %vm1721_vm2, %v2343_v8, %v1718_v16 }
0x11cd   :  { %v1733_v23 = vmul.f32 %v1722_v18, %v1699_v60 }
0x11ce   :  { %v1726_v19 = vmul.f32 0.5, %v1725_v17  ;;  %v2183_v17 = vld [vmem:[%s2936_s11 + $0x8] sm:$0xff] }
0x11cf   :  { %v1736_v24 = vmul.f32 %v1735_v21, %v1733_v23  ;;  %1926 = vmatpush.bf16.msrb.mxu1 %v2183_v17 }
0x11d0   :  { %v1727_v20 = vsub.f32 1.5, %v1726_v19 }
0x11d1   :  { %v1739_v32 = vadd.f32 %v1738_v27, %v1736_v24 }
0x11d2   :  { %v1728_v22 = vmul.f32 %v2345_v14, %v1727_v20 }
0x11d4   :  { %v1732_v25 = vsel %vm1731_vm6, %v2345_v14, %v1728_v22 }
0x11d5   :  { %v1734_v28 = vmul.f32 %v1732_v25, %v1700_v0  ;;  %v1805_v0 = vperm.slane %v2733_v15, 5 }
0x11d7   :  { %v1737_v30 = vmul.f32 %v1735_v21, %v1734_v28  ;;  %v2182_v21 = vld [vmem:[%s2936_s11] sm:$0xff] }
0x11d8   :  { %1927 = vmatpush.bf16.msrb.mxu1 %v2182_v21 }
0x11d9   :  { %v1740_v33 = vadd.f32 %v1738_v27, %v1737_v30 }
0x11db   :  { %v1746_v34 = vpack.c.bf16 %v1740_v33, %v1739_v32 }
0x11dd   :  { %2118 = vmatmul.msk.bf16.vlgmr.msrb.gmra.mxu2 %vm164_vm8, %v1746_v34 }
0x1260   :  { %v1772_v29 = vpop.f32.mrf.mxu2 }
0x1261   :  { %v1773_v40 = vadd.f32 %v1772_v29, %v1747_v39 }
0x1263   :  { %v1779_v41 = vmul.f32 0.044715, %v1773_v40  ;;  %v1777_v59 = vmul.f32 0.5, %v1773_v40 }
0x1265   :  { %v1781_v42 = vmul.f32 %v1779_v41, %v1773_v40 }
0x1267   :  { %v1783_v43 = vmul.f32 %v1781_v42, %v1773_v40  ;;  %v1896_v42 = vperm.slane %v2733_v15, 7 }
0x1268   :  { %v1774_v44 = vpop.f32.mrf.mxu2 }
0x1269   :  { %v1785_v46 = vadd.f32 %v1783_v43, %v1773_v40  ;;  %v1775_v48 = vadd.f32 %v1774_v44, %v1747_v39 }
0x126b   :  { %v1780_v49 = vmul.f32 0.044715, %v1775_v48  ;;  %v1787_v50 = vmul.f32 0.7978846, %v1785_v46  ;;  %v1778_v60 = vmul.f32 0.5, %v1775_v48 }
0x126d   :  { %v1782_v51 = vmul.f32 %v1780_v49, %v1775_v48  ;;  %2346 = vtanh.f32 %v1787_v50 }
0x126f   :  { %v1784_v53 = vmul.f32 %v1782_v51, %v1775_v48  ;;  %v2185_v51 = vld [vmem:[%s2937_s12 + $0x8] sm:$0xff] }
0x1270   :  { %1963 = vmatpush.bf16.msrb.mxu3 %v2185_v51 }
0x1271   :  { %v1786_v54 = vadd.f32 %v1784_v53, %v1775_v48  ;;  %v2184_v53 = vld [vmem:[%s2937_s12] sm:$0xff] }
0x1273   :  { %v1788_v55 = vmul.f32 0.7978846, %v1786_v54  ;;  %v2347_v56 = vpop.eup %2346 }
0x1274   :  { %v1791_v57 = vadd.f32 1.0, %v2347_v56  ;;  %1964 = vmatpush.bf16.msrb.mxu3 %v2184_v53 }
0x1275   :  { %2348 = vtanh.f32 %v1788_v55 }
0x1276   :  { %v1793_v62 = vmul.f32 %v1791_v57, %v1777_v59 }
0x127b   :  { %v2349_v58 = vpop.eup %2348 }
0x127c   :  { %v1792_v61 = vadd.f32 1.0, %v2349_v58 }
0x127e   :  { %v1794_v63 = vmul.f32 %v1792_v61, %v1778_v60 }
0x1280   :  { %v1804_v12 = vpack.c.bf16 %v1794_v63, %v1793_v62 }
0x1282   :  { %2143 = vmatmul.msk.bf16.vlgmr.msrb.gmra.mxu0 %vm997_vm10, %v1804_v12 }
0x12ff   :  { %v1842_v1 = vpop.f32.mrf.mxu0 }
0x1300   :  { %v1843_v2 = vadd.f32 %v1842_v1, %v1805_v0 }
0x1302   :  { %v1847_v13 = vadd.f32 %v1843_v2, %v1739_v32 }
0x1304   :  { %v1849_v3 = vsel %vm164_vm8, %v1847_v13, 0.0 }
0x1305   :  { %1850 = vadd.xlane.f32.xlu0 %v1849_v3 }
0x1307   :  { %v1844_v38 = vpop.f32.mrf.mxu0 }
0x1308   :  { %v1845_v52 = vadd.f32 %v1844_v38, %v1805_v0 }
0x130a   :  { %v1848_v4 = vadd.f32 %v1845_v52, %v1740_v33 }
0x130c   :  { %v1852_v5 = vsel %vm164_vm8, %v1848_v4, 0.0 }
0x130d   :  { %1853 = vadd.xlane.f32.xlu0 %v1852_v5 }
0x1378   :  { %v1851_v6 = vpop.xlane.xlu0 %1850 }
0x1379   :  { %v1855_v8 = vmul.f32 %v1851_v6, %v2510_v47 }
0x137b   :  { %v1857_v9 = vsub.f32 %v1847_v13, %v1855_v8 }
0x137d   :  { %v1859_v10 = vmul.f32 %v1857_v9, %v1857_v9 }
0x137f   :  { %v1861_v45 = vsel %vm164_vm8, %v1859_v10, 0.0 }
0x1380   :  { %1862 = vadd.xlane.f32.xlu0 %v1861_v45  ;;  %v1854_v11 = vpop.xlane.xlu0 %1853 }
0x1381   :  { %v1856_v7 = vmul.f32 %v1854_v11, %v2510_v47 }
0x1383   :  { %v1858_v14 = vsub.f32 %v1848_v4, %v1856_v7 }
0x1385   :  { %v1860_v16 = vmul.f32 %v1858_v14, %v1858_v14 }
0x1387   :  { %v1864_v26 = vsel %vm164_vm8, %v1860_v16, 0.0 }
0x1388   :  { %1865 = vadd.xlane.f32.xlu1 %v1864_v26 }
0x13f3   :  { %v1863_v18 = vpop.xlane.xlu0 %1862 }
0x13f4   :  { %v1867_v19 = vmul.f32 %v1863_v18, %v2510_v47 }
0x13f6   :  { %v1869_v20 = vadd.f32 1e-12, %v1867_v19 }
0x13f8   :  { %2350 = vrsqrt.f32 %v1869_v20  ;;  %vm1877_vm9 = vweird.f32 %v1869_v20 }
0x13fb   :  { %v1866_v23 = vpop.xlane.xlu1 %1865 }
0x13fc   :  { %v1868_v22 = vmul.f32 %v1866_v23, %v2510_v47  ;;  %v1893_v47 = vperm.slane %v2733_v15, 6  ;;  %v2358_v15 = vld [vmem:[%s2930_s13] sm:$0xf] }
0x13fd   :  { %v1904_v55 = vperm.slane %v2358_v15, 2  ;;  %v1941_v62 = vperm.slane %v2358_v15, 3 }
0x13fe   :  { %v2351_v25 = vpop.eup %2350  ;;  %v1870_v27 = vadd.f32 1e-12, %v1868_v22 }
0x13ff   :  { %v1872_v24 = vmul.f32 %v2351_v25, %v1869_v20  ;;  %vm1878_vm7 = vweird.f32 %v2351_v25 }
0x1400   :  { %2352 = vrsqrt.f32 %v1870_v27  ;;  %vm1879_vm10 = vmor %vm1877_vm9, %vm1878_vm7  ;;  %vm1887_vm12 = vweird.f32 %v1870_v27 }
0x1401   :  { %v1873_v28 = vmul.f32 %v2351_v25, %v1872_v24 }
0x1403   :  { %v1874_v30 = vmul.f32 0.5, %v1873_v28 }
0x1405   :  { %v1875_v32 = vsub.f32 1.5, %v1874_v30 }
0x1406   :  { %v2353_v33 = vpop.eup %2352 }
0x1407   :  { %v1876_v34 = vmul.f32 %v2351_v25, %v1875_v32  ;;  %v1882_v35 = vmul.f32 %v2353_v33, %v1870_v27  ;;  %vm1888_vm11 = vweird.f32 %v2353_v33 }
0x1408   :  { %vm1889_vm13 = vmor %vm1887_vm12, %vm1888_vm11 }
0x1409   :  { %v1883_v36 = vmul.f32 %v2353_v33, %v1882_v35  ;;  %v1880_v31 = vsel %vm1879_vm10, %v2351_v25, %v1876_v34 }
0x140a   :  { %v1891_v29 = vmul.f32 %v1880_v31, %v1857_v9 }
0x140b   :  { %v1884_v37 = vmul.f32 0.5, %v1883_v36 }
0x140c   :  { %v1894_v43 = vmul.f32 %v1893_v47, %v1891_v29 }
0x140d   :  { %v1885_v39 = vsub.f32 1.5, %v1884_v37 }
0x140e   :  { %v1897_v48 = vadd.f32 %v1896_v42, %v1894_v43 }
0x140f   :  { %v1886_v40 = vmul.f32 %v2353_v33, %v1885_v39 }
0x1411   :  { %v1890_v41 = vsel %vm1889_vm13, %v2353_v33, %v1886_v40 }
0x1412   :  { %v1892_v44 = vmul.f32 %v1890_v41, %v1858_v14 }
0x1414   :  { %v1895_v46 = vmul.f32 %v1893_v47, %v1892_v44 }
0x1416   :  { %v1898_v49 = vadd.f32 %v1896_v42, %v1895_v46 }
0x1418   :  { %v1903_v50 = vpack.c.bf16 %v1898_v49, %v1897_v48 }
0x141a   :  { %2152 = vmatmul.msk.bf16.vlgmr.msrb.gmra.mxu1 %vm164_vm8, %v1903_v50 }
0x1497   :  { %v1929_v54 = vpop.f32.mrf.mxu1 }
0x1498   :  { %v1930_v56 = vadd.f32 %v1929_v54, %v1904_v55 }
0x149a   :  { %2354 = vtanh.f32 %v1930_v56 }
0x149f   :  { %v1931_v57 = vpop.f32.mrf.mxu1 }
0x14a0   :  { %v1932_v58 = vadd.f32 %v1931_v57, %v1904_v55  ;;  %v2355_v59 = vpop.eup %2354 }
0x14a2   :  { %2356 = vtanh.f32 %v1932_v58 }
0x14a8   :  { %v2357_v60 = vpop.eup %2356 }
0x14a9   :  { %v1940_v61 = vpack.c.bf16 %v2357_v60, %v2355_v59 }
0x14ab   :  { %2161 = vmatmul.msk.bf16.vlgmr.msrb.gmra.mxu3 %vm164_vm8, %v1940_v61 }
0x152e   :  { %v1966_v63 = vpop.f32.mrf.mxu3 }
0x152f   :  { %v1967_v12 = vadd.f32 %v1966_v63, %v1941_v62 }
0x1531   :  { %1971 = vst [vmem:[%s2938_s14] sm:$0xff] %v1967_v12 }
0x1536   :  { %v1968_v0 = vpop.f32.mrf.mxu3 }
0x1537   :  { %v1969_v1 = vadd.f32 %v1968_v0, %v1941_v62 }
0x1539   :  { %1972 = vst [vmem:[%s2938_s14 + $0x8] sm:$0xff] %v1969_v1 }

</bundles_post_ra>
